<compile_context>
chip_gen: v6e
topology: v6e:2x2x1
jax: 0.10.0
libtpu: 0.0.40
codegen_flags: <defaults>
</compile_context>

<pallas_src>
import jax
import jax.numpy as jnp
from jax.experimental import pallas as pl
from jax.experimental.pallas import tpu as pltpu

# ------------------------- small synthetic T5 config -------------------------
VOCAB   = 256          # (real flan-t5-base: 32128)
D_MODEL = 32           # (real: 768)
N_HEADS = 4            # (real: 12)
D_HEAD  = D_MODEL // N_HEADS
D_FF    = 64           # (real: 2048, gated-GELU)
EPS     = 1e-6
NEG_INF = -1e9


# --------------------------- in-kernel helper math ----------------------------

def _rms(x, w):
    """T5 LayerNorm: no mean subtraction, no bias. x:(S,D) f32, w:(1,D) f32."""
    var = jnp.mean(x * x, axis=-1, keepdims=True)
    return x * jax.lax.rsqrt(var + EPS) * w


def _mha(q, k, v, wo, bias):
    """All-heads attention + output projection, fully in-VMEM.

    q:(Sq,D), k,v:(Sk,D) f32; wo:(D,D) bf16; bias broadcastable to (Sq,Sk) f32.
    NOTE: T5 does NOT scale scores by 1/sqrt(d_head).
    """
    ctxs = []
    for h in range(N_HEADS):
        sl = slice(h * D_HEAD, (h + 1) * D_HEAD)
        qh = q[:, sl].astype(jnp.bfloat16)
        kh = k[:, sl].astype(jnp.bfloat16)
        vh = v[:, sl].astype(jnp.bfloat16)
        # Contract the head dim of both operands -> no materialized k.T.
        s = jax.lax.dot_general(qh, kh, (((1,), (1,)), ((), ())),
                                preferred_element_type=jnp.float32)   # (Sq,Sk)
        s = s + bias                                   # mask math stays f32
        s = s - jnp.max(s, axis=-1, keepdims=True)
        p = jnp.exp(s)
        p = p * pl.reciprocal(jnp.sum(p, axis=-1, keepdims=True), approx=True)
        ctxs.append(jnp.dot(p.astype(jnp.bfloat16), vh,
                            preferred_element_type=jnp.float32))      # (Sq,Dh)
    ctx = jnp.concatenate(ctxs, axis=-1)               # (Sq, D)
    return jnp.dot(ctx.astype(jnp.bfloat16), wo,
                   preferred_element_type=jnp.float32)


def _gated_gelu_ffn(h, ln_w, wi0, wi1, wff):
    """T5 v1.1 gated-GELU MLP on the normalized residual stream."""
    n = _rms(h, ln_w).astype(jnp.bfloat16)
    hg = jax.nn.gelu(jnp.dot(n, wi0, preferred_element_type=jnp.float32),
                     approximate=True)                 # f32 elementwise
    hl = jnp.dot(n, wi1, preferred_element_type=jnp.float32)
    return jnp.dot((hg * hl).astype(jnp.bfloat16), wff,
                   preferred_element_type=jnp.float32)


# ------------------------------ fused block kernels ---------------------------

def _encoder_block_kernel(x_ref, kbias_ref, ln_attn_ref, wqkv_ref, wo_ref,
                          ln_ff_ref, wi0_ref, wi1_ref, wff_ref, ln_final_ref,
                          o_ref):
    x = x_ref[0].astype(jnp.float32)            # (Se, D)
    kbias = kbias_ref[0]                        # (1, Se) additive padding bias

    # ---- self attention ----
    n = _rms(x, ln_attn_ref[...])
    qkv = jnp.dot(n.astype(jnp.bfloat16), wqkv_ref[...],
                  preferred_element_type=jnp.float32)         # (Se, 3D)
    q = qkv[:, :D_MODEL]
    k = qkv[:, D_MODEL:2 * D_MODEL]
    v = qkv[:, 2 * D_MODEL:]
    h = x + _mha(q, k, v, wo_ref[...], kbias)

    # ---- gated-GELU FFN ----
    h = h + _gated_gelu_ffn(h, ln_ff_ref[...], wi0_ref[...], wi1_ref[...],
                            wff_ref[...])

    # ---- encoder final RMSNorm (single-layer stack) ----
    o_ref[0] = _rms(h, ln_final_ref[...]).astype(o_ref.dtype)


def _decoder_block_kernel(x_ref, enc_ref, self_kbias_ref, cross_kbias_ref,
                          ln_self_ref, wqkv_s_ref, wo_s_ref,
                          ln_cross_ref, wq_c_ref, wkv_c_ref, wo_c_ref,
                          ln_ff_ref, wi0_ref, wi1_ref, wff_ref,
                          ln_final_ref, o_ref):
    x = x_ref[0].astype(jnp.float32)            # (Sd, D)
    enc = enc_ref[0].astype(jnp.float32)        # (Se, D)
    Sd = x.shape[0]

    # Causal + padding bias built in-kernel (no (B,H,Sq,Sk) tensor in HBM).
    row = jax.lax.broadcasted_iota(jnp.int32, (Sd, Sd), 0)
    col = jax.lax.broadcasted_iota(jnp.int32, (Sd, Sd), 1)
    causal = jnp.where(col <= row, 0.0, NEG_INF).astype(jnp.float32)
    self_bias = causal + self_kbias_ref[0]      # (Sd, Sd), f32

    # ---- causal self attention ----
    n = _rms(x, ln_self_ref[...])
    qkv = jnp.dot(n.astype(jnp.bfloat16), wqkv_s_ref[...],
                  preferred_element_type=jnp.float32)
    q = qkv[:, :D_MODEL]
    k = qkv[:, D_MODEL:2 * D_MODEL]
    v = qkv[:, 2 * D_MODEL:]
    h = x + _mha(q, k, v, wo_s_ref[...], self_bias)

    # ---- cross attention over the encoder output ----
    n = _rms(h, ln_cross_ref[...])
    q = jnp.dot(n.astype(jnp.bfloat16), wq_c_ref[...],
                preferred_element_type=jnp.float32)           # (Sd, D)
    kv = jnp.dot(enc.astype(jnp.bfloat16), wkv_c_ref[...],
                 preferred_element_type=jnp.float32)          # (Se, 2D)
    k = kv[:, :D_MODEL]
    v = kv[:, D_MODEL:]
    h = h + _mha(q, k, v, wo_c_ref[...], cross_kbias_ref[0])

    # ---- gated-GELU FFN ----
    h = h + _gated_gelu_ffn(h, ln_ff_ref[...], wi0_ref[...], wi1_ref[...],
                            wff_ref[...])

    # ---- decoder final RMSNorm (single-layer stack) ----
    o_ref[0] = _rms(h, ln_final_ref[...]).astype(o_ref.dtype)


def _lm_head_kernel(x_ref, w_ref, o_ref):
    o_ref[...] = jnp.dot(x_ref[...].astype(jnp.bfloat16), w_ref[...],
                         preferred_element_type=jnp.float32)


# ------------------------------- pallas wrappers ------------------------------

def _whole(shape):
    """Whole-array resident block (index does not depend on the grid)."""
    return pl.BlockSpec(shape, lambda b: (0,) * len(shape))


def encoder_block(x, key_bias, p, ln_final):
    B, Se, D = x.shape
    return pl.pallas_call(
        _encoder_block_kernel,
        out_shape=jax.ShapeDtypeStruct((B, Se, D), jnp.float32),
        grid=(B,),
        in_specs=[
            pl.BlockSpec((1, Se, D), lambda b: (b, 0, 0)),     # x
            pl.BlockSpec((1, 1, Se), lambda b: (b, 0, 0)),     # padding key bias
            _whole((1, D)),                                    # ln_attn
            _whole((D, 3 * D)),                                # packed W_qkv
            _whole((D, D)),                                    # W_o
            _whole((1, D)),                                    # ln_ff
            _whole((D, D_FF)),                                 # wi0
            _whole((D, D_FF)),                                 # wi1
            _whole((D_FF, D)),                                 # wo (ffn)
            _whole((1, D)),                                    # final ln
        ],
        out_specs=pl.BlockSpec((1, Se, D), lambda b: (b, 0, 0)),
        compiler_params=pltpu.CompilerParams(
            dimension_semantics=("parallel",)),
    )(x, key_bias, p["ln_attn"], p["attn"]["wqkv"], p["attn"]["wo"],
      p["ln_ff"], p["ff"]["wi0"], p["ff"]["wi1"], p["ff"]["wo"], ln_final)


def decoder_block(x, enc_out, self_key_bias, cross_key_bias, p, ln_final):
    B, Sd, D = x.shape
    Se = enc_out.shape[1]
    return pl.pallas_call(
        _decoder_block_kernel,
        out_shape=jax.ShapeDtypeStruct((B, Sd, D), jnp.float32),
        grid=(B,),
        in_specs=[
            pl.BlockSpec((1, Sd, D), lambda b: (b, 0, 0)),     # x
            pl.BlockSpec((1, Se, D), lambda b: (b, 0, 0)),     # encoder output
            pl.BlockSpec((1, 1, Sd), lambda b: (b, 0, 0)),     # self key bias
            pl.BlockSpec((1, 1, Se), lambda b: (b, 0, 0)),     # cross key bias
            _whole((1, D)),                                    # ln_self
            _whole((D, 3 * D)),                                # packed W_qkv (self)
            _whole((D, D)),                                    # W_o (self)
            _whole((1, D)),                                    # ln_cross
            _whole((D, D)),                                    # W_q (cross)
            _whole((D, 2 * D)),                                # packed W_kv (cross)
            _whole((D, D)),                                    # W_o (cross)
            _whole((1, D)),                                    # ln_ff
            _whole((D, D_FF)),                                 # wi0
            _whole((D, D_FF)),                                 # wi1
            _whole((D_FF, D)),                                 # wo (ffn)
            _whole((1, D)),                                    # final ln
        ],
        out_specs=pl.BlockSpec((1, Sd, D), lambda b: (b, 0, 0)),
        compiler_params=pltpu.CompilerParams(
            dimension_semantics=("parallel",)),
    )(x, enc_out, self_key_bias, cross_key_bias,
      p["ln_self"], p["self_attn"]["wqkv"], p["self_attn"]["wo"],
      p["ln_cross"], p["cross_attn"]["wq"], p["cross_attn"]["wkv"],
      p["cross_attn"]["wo"], p["ln_ff"], p["ff"]["wi0"], p["ff"]["wi1"],
      p["ff"]["wo"], ln_final)


def lm_head(x, w, *, tn=128):
    """(M, D) @ (D, VOCAB), tiled over the vocab axis in 128-lane blocks.

    This is the pattern that scales to the real 768x32128 head: at that scale
    the weight must be streamed through VMEM in lane-dense tiles (and on v7x
    the VMEM budget is 64 MiB, so whole-array blocks are not an option)."""
    M, K = x.shape
    N = w.shape[1]
    assert N % tn == 0
    return pl.pallas_call(
        _lm_head_kernel,
        out_shape=jax.ShapeDtypeStruct((M, N), jnp.float32),
        grid=(pl.cdiv(N, tn),),
        in_specs=[pl.BlockSpec((M, K), lambda j: (0, 0)),
                  pl.BlockSpec((K, tn), lambda j: (0, j))],
        out_specs=pl.BlockSpec((M, tn), lambda j: (0, j)),
        compiler_params=pltpu.CompilerParams(
            dimension_semantics=("parallel",)),
    )(x, w)


# -------------------------------- glue (JAX) ----------------------------------

def _key_bias(mask):
    """{0,1} padding mask (B, Sk) -> tiny additive key bias (B, 1, Sk)."""
    return ((1.0 - mask.astype(jnp.float32)) * NEG_INF)[:, None, :]


def t5_fine_tuner_forward(params, input_ids, attention_mask=None,
                          decoder_input_ids=None, decoder_attention_mask=None):
    """Mirror of T5FineTuner.forward (frozen T5 run) -> logits (B, Sd, VOCAB)."""
    B, Se = input_ids.shape
    Sd = decoder_input_ids.shape[1]
    if attention_mask is None:
        attention_mask = jnp.ones((B, Se), jnp.int32)
    if decoder_attention_mask is None:
        decoder_attention_mask = jnp.ones((B, Sd), jnp.int32)

    # Token embedding gather stays in plain-JAX glue.
    enc_x = jnp.take(params["embed"], input_ids, axis=0)
    dec_x = jnp.take(params["embed"], decoder_input_ids, axis=0)

    enc_key_bias = _key_bias(attention_mask)
    dec_key_bias = _key_bias(decoder_attention_mask)

    enc_out = encoder_block(enc_x, enc_key_bias, params["encoder"],
                            params["enc_final_ln"])
    dec_out = decoder_block(dec_x, enc_out, dec_key_bias, enc_key_bias,
                            params["decoder"], params["dec_final_ln"])

    # LM head (untied, unscaled — as in flan-t5 / T5 v1.1).
    logits = lm_head(dec_out.reshape(B * Sd, D_MODEL),
                     params["lm_head"]).reshape(B, Sd, VOCAB)
    # The PyTorch module only rewraps outputs.logits in a Variable (autograd
    # bookkeeping, no compute), so logits are returned directly.
    return logits


# --------------------------- deterministic params -----------------------------

def init_params(key):
    def nrm(k, shape, scale=0.02, dtype=jnp.bfloat16):
        return (scale * jax.random.normal(k, shape, jnp.float32)).astype(dtype)

    keys = iter(jax.random.split(key, 64))
    attn_self = lambda: {"wqkv": nrm(next(keys), (D_MODEL, 3 * D_MODEL)),
                         "wo":   nrm(next(keys), (D_MODEL, D_MODEL))}
    attn_cross = lambda: {"wq":  nrm(next(keys), (D_MODEL, D_MODEL)),
                          "wkv": nrm(next(keys), (D_MODEL, 2 * D_MODEL)),
                          "wo":  nrm(next(keys), (D_MODEL, D_MODEL))}
    ff = lambda: {"wi0": nrm(next(keys), (D_MODEL, D_FF)),
                  "wi1": nrm(next(keys), (D_MODEL, D_FF)),
                  "wo":  nrm(next(keys), (D_FF, D_MODEL))}
    ln = lambda: jnp.ones((1, D_MODEL), jnp.float32)

    return {
        "embed": jax.random.normal(next(keys), (VOCAB, D_MODEL), jnp.float32),
        "encoder": {"ln_attn": ln(), "attn": attn_self(),
                    "ln_ff": ln(), "ff": ff()},
        "enc_final_ln": ln(),
        "decoder": {"ln_self": ln(), "self_attn": attn_self(),
                    "ln_cross": ln(), "cross_attn": attn_cross(),
                    "ln_ff": ln(), "ff": ff()},
        "dec_final_ln": ln(),
        "lm_head": nrm(next(keys), (D_MODEL, VOCAB)),
    }


# ----------------------------------- main --------------------------------------

if __name__ == "__main__":
    key = jax.random.PRNGKey(0)
    pkey, ikey = jax.random.split(key)
    params = init_params(pkey)

    B, Se, Sd = 2, 8, 8
    input_ids = jax.random.randint(ikey, (B, Se), 0, VOCAB, dtype=jnp.int32)
    attention_mask = jnp.ones((B, Se), jnp.int32)
    decoder_start_token = 0  # pad token id, as in the original script
    decoder_input_ids = jnp.full((B, Sd), decoder_start_token, dtype=jnp.int32)

    fwd = jax.jit(t5_fine_tuner_forward)
    logits = fwd(params, input_ids, attention_mask, decoder_input_ids, None)
    jax.block_until_ready(logits)
    assert logits.shape == (B, Sd, VOCAB) and logits.dtype == jnp.float32
    print("KERNEL_OK")
</pallas_src>

<mosaic_0001>
module attributes {stable_mosaic.version = 11 : i64} {
  func.func @_decoder_block_kernel(%arg0: i32, %arg1: memref<1x8x32xf32, #tpu.memory_space<vmem>>, %arg2: memref<1x8x32xf32, #tpu.memory_space<vmem>>, %arg3: memref<1x1x8xf32, #tpu.memory_space<vmem>>, %arg4: memref<1x1x8xf32, #tpu.memory_space<vmem>>, %arg5: memref<1x32xf32, #tpu.memory_space<vmem>>, %arg6: memref<32x96xbf16, #tpu.memory_space<vmem>>, %arg7: memref<32x32xbf16, #tpu.memory_space<vmem>>, %arg8: memref<1x32xf32, #tpu.memory_space<vmem>>, %arg9: memref<32x32xbf16, #tpu.memory_space<vmem>>, %arg10: memref<32x64xbf16, #tpu.memory_space<vmem>>, %arg11: memref<32x32xbf16, #tpu.memory_space<vmem>>, %arg12: memref<1x32xf32, #tpu.memory_space<vmem>>, %arg13: memref<32x64xbf16, #tpu.memory_space<vmem>>, %arg14: memref<32x64xbf16, #tpu.memory_space<vmem>>, %arg15: memref<64x32xbf16, #tpu.memory_space<vmem>>, %arg16: memref<1x32xf32, #tpu.memory_space<vmem>>, %arg17: memref<1x8x32xf32, #tpu.memory_space<vmem>>) attributes {dimension_semantics = [#tpu.dimension_semantics<parallel>], iteration_bounds = array<i64: 2>, scalar_prefetch = 0 : i64, scratch_operands = 0 : i64, tpu.core_type = #tpu.core_type<tc>, window_params = [{transform_indices = @transform_0, window_bounds = array<i64: 1, 8, 32>}, {transform_indices = @transform_1, window_bounds = array<i64: 1, 8, 32>}, {transform_indices = @transform_2, window_bounds = array<i64: 1, 1, 8>}, {transform_indices = @transform_3, window_bounds = array<i64: 1, 1, 8>}, {pipeline_mode = #tpu.pipeline_mode<synchronous>, transform_indices = @transform_4, window_bounds = array<i64: 1, 32>}, {pipeline_mode = #tpu.pipeline_mode<synchronous>, transform_indices = @transform_5, window_bounds = array<i64: 32, 96>}, {pipeline_mode = #tpu.pipeline_mode<synchronous>, transform_indices = @transform_6, window_bounds = array<i64: 32, 32>}, {pipeline_mode = #tpu.pipeline_mode<synchronous>, transform_indices = @transform_7, window_bounds = array<i64: 1, 32>}, {pipeline_mode = #tpu.pipeline_mode<synchronous>, transform_indices = @transform_8, window_bounds = array<i64: 32, 32>}, {pipeline_mode = #tpu.pipeline_mode<synchronous>, transform_indices = @transform_9, window_bounds = array<i64: 32, 64>}, {pipeline_mode = #tpu.pipeline_mode<synchronous>, transform_indices = @transform_10, window_bounds = array<i64: 32, 32>}, {pipeline_mode = #tpu.pipeline_mode<synchronous>, transform_indices = @transform_11, window_bounds = array<i64: 1, 32>}, {pipeline_mode = #tpu.pipeline_mode<synchronous>, transform_indices = @transform_12, window_bounds = array<i64: 32, 64>}, {pipeline_mode = #tpu.pipeline_mode<synchronous>, transform_indices = @transform_13, window_bounds = array<i64: 32, 64>}, {pipeline_mode = #tpu.pipeline_mode<synchronous>, transform_indices = @transform_14, window_bounds = array<i64: 64, 32>}, {pipeline_mode = #tpu.pipeline_mode<synchronous>, transform_indices = @transform_15, window_bounds = array<i64: 1, 32>}, {transform_indices = @transform_16, window_bounds = array<i64: 1, 8, 32>}]} {
    %c0 = arith.constant 0 : index
    %c0_0 = arith.constant 0 : index
    %c0_1 = arith.constant 0 : index
    %0 = vector.load %arg1[%c0, %c0_0, %c0_1] : memref<1x8x32xf32, #tpu.memory_space<vmem>>, vector<1x8x32xf32>
    %1 = vector.shape_cast %0 : vector<1x8x32xf32> to vector<8x32xf32>
    %c0_2 = arith.constant 0 : index
    %c0_3 = arith.constant 0 : index
    %c0_4 = arith.constant 0 : index
    %2 = vector.load %arg2[%c0_2, %c0_3, %c0_4] : memref<1x8x32xf32, #tpu.memory_space<vmem>>, vector<1x8x32xf32>
    %3 = vector.shape_cast %2 : vector<1x8x32xf32> to vector<8x32xf32>
    %4 = tpu.iota {dimensions = array<i32: 0>} : vector<8x8xi32>
    %5 = tpu.iota {dimensions = array<i32: 1>} : vector<8x8xi32>
    %6 = arith.cmpi sle, %5, %4 : vector<8x8xi32>
    %cst = arith.constant 0.000000e+00 : f32
    %cst_5 = arith.constant -1.000000e+09 : f32
    %7 = vector.broadcast %cst : f32 to vector<8x8xf32>
    %8 = vector.broadcast %cst_5 : f32 to vector<8x8xf32>
    %9 = arith.select %6, %7, %8 : vector<8x8xi1>, vector<8x8xf32>
    %c0_6 = arith.constant 0 : index
    %c0_7 = arith.constant 0 : index
    %c0_8 = arith.constant 0 : index
    %10 = vector.load %arg3[%c0_6, %c0_7, %c0_8] : memref<1x1x8xf32, #tpu.memory_space<vmem>>, vector<1x1x8xf32>
    %11 = vector.shape_cast %10 : vector<1x1x8xf32> to vector<1x8xf32>
    %12 = vector.broadcast %11 : vector<1x8xf32> to vector<8x8xf32>
    %13 = arith.addf %9, %12 : vector<8x8xf32>
    %c0_9 = arith.constant 0 : index
    %c0_10 = arith.constant 0 : index
    %14 = vector.load %arg5[%c0_9, %c0_10] : memref<1x32xf32, #tpu.memory_space<vmem>>, vector<1x32xf32>
    %15 = arith.mulf %1, %1 : vector<8x32xf32>
    %cst_11 = arith.constant dense<0.000000e+00> : vector<8xf32>
    %16 = vector.multi_reduction <add>, %15, %cst_11 [1] : vector<8x32xf32> to vector<8xf32>
    %17 = vector.shape_cast %16 : vector<8xf32> to vector<8x1xf32>
    %cst_12 = arith.constant 3.200000e+01 : f32
    %18 = vector.broadcast %cst_12 : f32 to vector<8x1xf32>
    %19 = arith.divf %17, %18 : vector<8x1xf32>
    %cst_13 = arith.constant 9.99999997E-7 : f32
    %20 = vector.broadcast %cst_13 : f32 to vector<8x1xf32>
    %21 = arith.addf %19, %20 : vector<8x1xf32>
    %22 = math.rsqrt %21 : vector<8x1xf32>
    %23 = vector.broadcast %22 : vector<8x1xf32> to vector<8x32xf32>
    %24 = arith.mulf %1, %23 : vector<8x32xf32>
    %25 = vector.broadcast %14 : vector<1x32xf32> to vector<8x32xf32>
    %26 = arith.mulf %24, %25 : vector<8x32xf32>
    %27 = arith.truncf %26 : vector<8x32xf32> to vector<8x32xbf16>
    %c0_14 = arith.constant 0 : index
    %c0_15 = arith.constant 0 : index
    %28 = vector.load %arg6[%c0_14, %c0_15] : memref<32x96xbf16, #tpu.memory_space<vmem>>, vector<32x96xbf16>
    %cst_16 = arith.constant dense<0.000000e+00> : vector<8x96xf32>
    %29 = tpu.matmul %27, %28, %cst_16 {dimension_numbers = #tpu.dot_dimension_numbers<[1], [0], [0], [1], [0, 0, 1, 1], [], []>} : vector<8x32xbf16>, vector<32x96xbf16>, vector<8x96xf32> -> vector<8x96xf32>
    %30 = vector.extract_strided_slice %29 {offsets = [0, 0], sizes = [8, 32], strides = [1, 1]} : vector<8x96xf32> to vector<8x32xf32>
    %31 = vector.extract_strided_slice %29 {offsets = [0, 32], sizes = [8, 32], strides = [1, 1]} : vector<8x96xf32> to vector<8x32xf32>
    %32 = vector.extract_strided_slice %29 {offsets = [0, 64], sizes = [8, 32], strides = [1, 1]} : vector<8x96xf32> to vector<8x32xf32>
    %c0_17 = arith.constant 0 : index
    %c0_18 = arith.constant 0 : index
    %33 = vector.load %arg7[%c0_17, %c0_18] : memref<32x32xbf16, #tpu.memory_space<vmem>>, vector<32x32xbf16>
    %34 = vector.extract_strided_slice %30 {offsets = [0, 0], sizes = [8, 8], strides = [1, 1]} : vector<8x32xf32> to vector<8x8xf32>
    %35 = arith.truncf %34 : vector<8x8xf32> to vector<8x8xbf16>
    %36 = vector.extract_strided_slice %31 {offsets = [0, 0], sizes = [8, 8], strides = [1, 1]} : vector<8x32xf32> to vector<8x8xf32>
    %37 = arith.truncf %36 : vector<8x8xf32> to vector<8x8xbf16>
    %38 = vector.extract_strided_slice %32 {offsets = [0, 0], sizes = [8, 8], strides = [1, 1]} : vector<8x32xf32> to vector<8x8xf32>
    %39 = arith.truncf %38 : vector<8x8xf32> to vector<8x8xbf16>
    %cst_19 = arith.constant dense<0.000000e+00> : vector<8x8xf32>
    %40 = tpu.matmul %35, %37, %cst_19 {dimension_numbers = #tpu.dot_dimension_numbers<[1], [1], [0], [0], [0, 0, 1, 0], [], []>} : vector<8x8xbf16>, vector<8x8xbf16>, vector<8x8xf32> -> vector<8x8xf32>
    %41 = arith.addf %40, %13 : vector<8x8xf32>
    %cst_20 = arith.constant dense<0xFF800000> : vector<8xf32>
    %42 = vector.multi_reduction <maximumf>, %41, %cst_20 [1] : vector<8x8xf32> to vector<8xf32>
    %43 = vector.shape_cast %42 : vector<8xf32> to vector<8x1xf32>
    %44 = vector.broadcast %43 : vector<8x1xf32> to vector<8x8xf32>
    %45 = arith.subf %41, %44 : vector<8x8xf32>
    %46 = math.exp %45 : vector<8x8xf32>
    %cst_21 = arith.constant dense<0.000000e+00> : vector<8xf32>
    %47 = vector.multi_reduction <add>, %46, %cst_21 [1] : vector<8x8xf32> to vector<8xf32>
    %48 = vector.shape_cast %47 : vector<8xf32> to vector<8x1xf32>
    %49 = tpu.reciprocal %48 {approx = true} : vector<8x1xf32> -> vector<8x1xf32>
    %50 = vector.broadcast %49 : vector<8x1xf32> to vector<8x8xf32>
    %51 = arith.mulf %46, %50 : vector<8x8xf32>
    %52 = arith.truncf %51 : vector<8x8xf32> to vector<8x8xbf16>
    %cst_22 = arith.constant dense<0.000000e+00> : vector<8x8xf32>
    %53 = tpu.matmul %52, %39, %cst_22 {dimension_numbers = #tpu.dot_dimension_numbers<[1], [0], [0], [1], [0, 0, 1, 1], [], []>} : vector<8x8xbf16>, vector<8x8xbf16>, vector<8x8xf32> -> vector<8x8xf32>
    %54 = vector.extract_strided_slice %30 {offsets = [0, 8], sizes = [8, 8], strides = [1, 1]} : vector<8x32xf32> to vector<8x8xf32>
    %55 = arith.truncf %54 : vector<8x8xf32> to vector<8x8xbf16>
    %56 = vector.extract_strided_slice %31 {offsets = [0, 8], sizes = [8, 8], strides = [1, 1]} : vector<8x32xf32> to vector<8x8xf32>
    %57 = arith.truncf %56 : vector<8x8xf32> to vector<8x8xbf16>
    %58 = vector.extract_strided_slice %32 {offsets = [0, 8], sizes = [8, 8], strides = [1, 1]} : vector<8x32xf32> to vector<8x8xf32>
    %59 = arith.truncf %58 : vector<8x8xf32> to vector<8x8xbf16>
    %cst_23 = arith.constant dense<0.000000e+00> : vector<8x8xf32>
    %60 = tpu.matmul %55, %57, %cst_23 {dimension_numbers = #tpu.dot_dimension_numbers<[1], [1], [0], [0], [0, 0, 1, 0], [], []>} : vector<8x8xbf16>, vector<8x8xbf16>, vector<8x8xf32> -> vector<8x8xf32>
    %61 = arith.addf %60, %13 : vector<8x8xf32>
    %cst_24 = arith.constant dense<0xFF800000> : vector<8xf32>
    %62 = vector.multi_reduction <maximumf>, %61, %cst_24 [1] : vector<8x8xf32> to vector<8xf32>
    %63 = vector.shape_cast %62 : vector<8xf32> to vector<8x1xf32>
    %64 = vector.broadcast %63 : vector<8x1xf32> to vector<8x8xf32>
    %65 = arith.subf %61, %64 : vector<8x8xf32>
    %66 = math.exp %65 : vector<8x8xf32>
    %cst_25 = arith.constant dense<0.000000e+00> : vector<8xf32>
    %67 = vector.multi_reduction <add>, %66, %cst_25 [1] : vector<8x8xf32> to vector<8xf32>
    %68 = vector.shape_cast %67 : vector<8xf32> to vector<8x1xf32>
    %69 = tpu.reciprocal %68 {approx = true} : vector<8x1xf32> -> vector<8x1xf32>
    %70 = vector.broadcast %69 : vector<8x1xf32> to vector<8x8xf32>
    %71 = arith.mulf %66, %70 : vector<8x8xf32>
    %72 = arith.truncf %71 : vector<8x8xf32> to vector<8x8xbf16>
    %cst_26 = arith.constant dense<0.000000e+00> : vector<8x8xf32>
    %73 = tpu.matmul %72, %59, %cst_26 {dimension_numbers = #tpu.dot_dimension_numbers<[1], [0], [0], [1], [0, 0, 1, 1], [], []>} : vector<8x8xbf16>, vector<8x8xbf16>, vector<8x8xf32> -> vector<8x8xf32>
    %74 = vector.extract_strided_slice %30 {offsets = [0, 16], sizes = [8, 8], strides = [1, 1]} : vector<8x32xf32> to vector<8x8xf32>
    %75 = arith.truncf %74 : vector<8x8xf32> to vector<8x8xbf16>
    %76 = vector.extract_strided_slice %31 {offsets = [0, 16], sizes = [8, 8], strides = [1, 1]} : vector<8x32xf32> to vector<8x8xf32>
    %77 = arith.truncf %76 : vector<8x8xf32> to vector<8x8xbf16>
    %78 = vector.extract_strided_slice %32 {offsets = [0, 16], sizes = [8, 8], strides = [1, 1]} : vector<8x32xf32> to vector<8x8xf32>
    %79 = arith.truncf %78 : vector<8x8xf32> to vector<8x8xbf16>
    %cst_27 = arith.constant dense<0.000000e+00> : vector<8x8xf32>
    %80 = tpu.matmul %75, %77, %cst_27 {dimension_numbers = #tpu.dot_dimension_numbers<[1], [1], [0], [0], [0, 0, 1, 0], [], []>} : vector<8x8xbf16>, vector<8x8xbf16>, vector<8x8xf32> -> vector<8x8xf32>
    %81 = arith.addf %80, %13 : vector<8x8xf32>
    %cst_28 = arith.constant dense<0xFF800000> : vector<8xf32>
    %82 = vector.multi_reduction <maximumf>, %81, %cst_28 [1] : vector<8x8xf32> to vector<8xf32>
    %83 = vector.shape_cast %82 : vector<8xf32> to vector<8x1xf32>
    %84 = vector.broadcast %83 : vector<8x1xf32> to vector<8x8xf32>
    %85 = arith.subf %81, %84 : vector<8x8xf32>
    %86 = math.exp %85 : vector<8x8xf32>
    %cst_29 = arith.constant dense<0.000000e+00> : vector<8xf32>
    %87 = vector.multi_reduction <add>, %86, %cst_29 [1] : vector<8x8xf32> to vector<8xf32>
    %88 = vector.shape_cast %87 : vector<8xf32> to vector<8x1xf32>
    %89 = tpu.reciprocal %88 {approx = true} : vector<8x1xf32> -> vector<8x1xf32>
    %90 = vector.broadcast %89 : vector<8x1xf32> to vector<8x8xf32>
    %91 = arith.mulf %86, %90 : vector<8x8xf32>
    %92 = arith.truncf %91 : vector<8x8xf32> to vector<8x8xbf16>
    %cst_30 = arith.constant dense<0.000000e+00> : vector<8x8xf32>
    %93 = tpu.matmul %92, %79, %cst_30 {dimension_numbers = #tpu.dot_dimension_numbers<[1], [0], [0], [1], [0, 0, 1, 1], [], []>} : vector<8x8xbf16>, vector<8x8xbf16>, vector<8x8xf32> -> vector<8x8xf32>
    %94 = vector.extract_strided_slice %30 {offsets = [0, 24], sizes = [8, 8], strides = [1, 1]} : vector<8x32xf32> to vector<8x8xf32>
    %95 = arith.truncf %94 : vector<8x8xf32> to vector<8x8xbf16>
    %96 = vector.extract_strided_slice %31 {offsets = [0, 24], sizes = [8, 8], strides = [1, 1]} : vector<8x32xf32> to vector<8x8xf32>
    %97 = arith.truncf %96 : vector<8x8xf32> to vector<8x8xbf16>
    %98 = vector.extract_strided_slice %32 {offsets = [0, 24], sizes = [8, 8], strides = [1, 1]} : vector<8x32xf32> to vector<8x8xf32>
    %99 = arith.truncf %98 : vector<8x8xf32> to vector<8x8xbf16>
    %cst_31 = arith.constant dense<0.000000e+00> : vector<8x8xf32>
    %100 = tpu.matmul %95, %97, %cst_31 {dimension_numbers = #tpu.dot_dimension_numbers<[1], [1], [0], [0], [0, 0, 1, 0], [], []>} : vector<8x8xbf16>, vector<8x8xbf16>, vector<8x8xf32> -> vector<8x8xf32>
    %101 = arith.addf %100, %13 : vector<8x8xf32>
    %cst_32 = arith.constant dense<0xFF800000> : vector<8xf32>
    %102 = vector.multi_reduction <maximumf>, %101, %cst_32 [1] : vector<8x8xf32> to vector<8xf32>
    %103 = vector.shape_cast %102 : vector<8xf32> to vector<8x1xf32>
    %104 = vector.broadcast %103 : vector<8x1xf32> to vector<8x8xf32>
    %105 = arith.subf %101, %104 : vector<8x8xf32>
    %106 = math.exp %105 : vector<8x8xf32>
    %cst_33 = arith.constant dense<0.000000e+00> : vector<8xf32>
    %107 = vector.multi_reduction <add>, %106, %cst_33 [1] : vector<8x8xf32> to vector<8xf32>
    %108 = vector.shape_cast %107 : vector<8xf32> to vector<8x1xf32>
    %109 = tpu.reciprocal %108 {approx = true} : vector<8x1xf32> -> vector<8x1xf32>
    %110 = vector.broadcast %109 : vector<8x1xf32> to vector<8x8xf32>
    %111 = arith.mulf %106, %110 : vector<8x8xf32>
    %112 = arith.truncf %111 : vector<8x8xf32> to vector<8x8xbf16>
    %cst_34 = arith.constant dense<0.000000e+00> : vector<8x8xf32>
    %113 = tpu.matmul %112, %99, %cst_34 {dimension_numbers = #tpu.dot_dimension_numbers<[1], [0], [0], [1], [0, 0, 1, 1], [], []>} : vector<8x8xbf16>, vector<8x8xbf16>, vector<8x8xf32> -> vector<8x8xf32>
    %114 = tpu.concatenate %53, %73, %93, %113 in 1 : vector<8x8xf32>, vector<8x8xf32>, vector<8x8xf32>, vector<8x8xf32> -> vector<8x32xf32>
    %115 = arith.truncf %114 : vector<8x32xf32> to vector<8x32xbf16>
    %cst_35 = arith.constant dense<0.000000e+00> : vector<8x32xf32>
    %116 = tpu.matmul %115, %33, %cst_35 {dimension_numbers = #tpu.dot_dimension_numbers<[1], [0], [0], [1], [0, 0, 1, 1], [], []>} : vector<8x32xbf16>, vector<32x32xbf16>, vector<8x32xf32> -> vector<8x32xf32>
    %117 = arith.addf %1, %116 : vector<8x32xf32>
    %c0_36 = arith.constant 0 : index
    %c0_37 = arith.constant 0 : index
    %118 = vector.load %arg8[%c0_36, %c0_37] : memref<1x32xf32, #tpu.memory_space<vmem>>, vector<1x32xf32>
    %119 = arith.mulf %117, %117 : vector<8x32xf32>
    %cst_38 = arith.constant dense<0.000000e+00> : vector<8xf32>
    %120 = vector.multi_reduction <add>, %119, %cst_38 [1] : vector<8x32xf32> to vector<8xf32>
    %121 = vector.shape_cast %120 : vector<8xf32> to vector<8x1xf32>
    %cst_39 = arith.constant 3.200000e+01 : f32
    %122 = vector.broadcast %cst_39 : f32 to vector<8x1xf32>
    %123 = arith.divf %121, %122 : vector<8x1xf32>
    %cst_40 = arith.constant 9.99999997E-7 : f32
    %124 = vector.broadcast %cst_40 : f32 to vector<8x1xf32>
    %125 = arith.addf %123, %124 : vector<8x1xf32>
    %126 = math.rsqrt %125 : vector<8x1xf32>
    %127 = vector.broadcast %126 : vector<8x1xf32> to vector<8x32xf32>
    %128 = arith.mulf %117, %127 : vector<8x32xf32>
    %129 = vector.broadcast %118 : vector<1x32xf32> to vector<8x32xf32>
    %130 = arith.mulf %128, %129 : vector<8x32xf32>
    %131 = arith.truncf %130 : vector<8x32xf32> to vector<8x32xbf16>
    %c0_41 = arith.constant 0 : index
    %c0_42 = arith.constant 0 : index
    %132 = vector.load %arg9[%c0_41, %c0_42] : memref<32x32xbf16, #tpu.memory_space<vmem>>, vector<32x32xbf16>
    %cst_43 = arith.constant dense<0.000000e+00> : vector<8x32xf32>
    %133 = tpu.matmul %131, %132, %cst_43 {dimension_numbers = #tpu.dot_dimension_numbers<[1], [0], [0], [1], [0, 0, 1, 1], [], []>} : vector<8x32xbf16>, vector<32x32xbf16>, vector<8x32xf32> -> vector<8x32xf32>
    %134 = arith.truncf %3 : vector<8x32xf32> to vector<8x32xbf16>
    %c0_44 = arith.constant 0 : index
    %c0_45 = arith.constant 0 : index
    %135 = vector.load %arg10[%c0_44, %c0_45] : memref<32x64xbf16, #tpu.memory_space<vmem>>, vector<32x64xbf16>
    %cst_46 = arith.constant dense<0.000000e+00> : vector<8x64xf32>
    %136 = tpu.matmul %134, %135, %cst_46 {dimension_numbers = #tpu.dot_dimension_numbers<[1], [0], [0], [1], [0, 0, 1, 1], [], []>} : vector<8x32xbf16>, vector<32x64xbf16>, vector<8x64xf32> -> vector<8x64xf32>
    %137 = vector.extract_strided_slice %136 {offsets = [0, 0], sizes = [8, 32], strides = [1, 1]} : vector<8x64xf32> to vector<8x32xf32>
    %138 = vector.extract_strided_slice %136 {offsets = [0, 32], sizes = [8, 32], strides = [1, 1]} : vector<8x64xf32> to vector<8x32xf32>
    %c0_47 = arith.constant 0 : index
    %c0_48 = arith.constant 0 : index
    %139 = vector.load %arg11[%c0_47, %c0_48] : memref<32x32xbf16, #tpu.memory_space<vmem>>, vector<32x32xbf16>
    %c0_49 = arith.constant 0 : index
    %c0_50 = arith.constant 0 : index
    %c0_51 = arith.constant 0 : index
    %140 = vector.load %arg4[%c0_49, %c0_50, %c0_51] : memref<1x1x8xf32, #tpu.memory_space<vmem>>, vector<1x1x8xf32>
    %141 = vector.shape_cast %140 : vector<1x1x8xf32> to vector<1x8xf32>
    %142 = vector.extract_strided_slice %133 {offsets = [0, 0], sizes = [8, 8], strides = [1, 1]} : vector<8x32xf32> to vector<8x8xf32>
    %143 = arith.truncf %142 : vector<8x8xf32> to vector<8x8xbf16>
    %144 = vector.extract_strided_slice %137 {offsets = [0, 0], sizes = [8, 8], strides = [1, 1]} : vector<8x32xf32> to vector<8x8xf32>
    %145 = arith.truncf %144 : vector<8x8xf32> to vector<8x8xbf16>
    %146 = vector.extract_strided_slice %138 {offsets = [0, 0], sizes = [8, 8], strides = [1, 1]} : vector<8x32xf32> to vector<8x8xf32>
    %147 = arith.truncf %146 : vector<8x8xf32> to vector<8x8xbf16>
    %cst_52 = arith.constant dense<0.000000e+00> : vector<8x8xf32>
    %148 = tpu.matmul %143, %145, %cst_52 {dimension_numbers = #tpu.dot_dimension_numbers<[1], [1], [0], [0], [0, 0, 1, 0], [], []>} : vector<8x8xbf16>, vector<8x8xbf16>, vector<8x8xf32> -> vector<8x8xf32>
    %149 = vector.broadcast %141 : vector<1x8xf32> to vector<8x8xf32>
    %150 = arith.addf %148, %149 : vector<8x8xf32>
    %cst_53 = arith.constant dense<0xFF800000> : vector<8xf32>
    %151 = vector.multi_reduction <maximumf>, %150, %cst_53 [1] : vector<8x8xf32> to vector<8xf32>
    %152 = vector.shape_cast %151 : vector<8xf32> to vector<8x1xf32>
    %153 = vector.broadcast %152 : vector<8x1xf32> to vector<8x8xf32>
    %154 = arith.subf %150, %153 : vector<8x8xf32>
    %155 = math.exp %154 : vector<8x8xf32>
    %cst_54 = arith.constant dense<0.000000e+00> : vector<8xf32>
    %156 = vector.multi_reduction <add>, %155, %cst_54 [1] : vector<8x8xf32> to vector<8xf32>
    %157 = vector.shape_cast %156 : vector<8xf32> to vector<8x1xf32>
    %158 = tpu.reciprocal %157 {approx = true} : vector<8x1xf32> -> vector<8x1xf32>
    %159 = vector.broadcast %158 : vector<8x1xf32> to vector<8x8xf32>
    %160 = arith.mulf %155, %159 : vector<8x8xf32>
    %161 = arith.truncf %160 : vector<8x8xf32> to vector<8x8xbf16>
    %cst_55 = arith.constant dense<0.000000e+00> : vector<8x8xf32>
    %162 = tpu.matmul %161, %147, %cst_55 {dimension_numbers = #tpu.dot_dimension_numbers<[1], [0], [0], [1], [0, 0, 1, 1], [], []>} : vector<8x8xbf16>, vector<8x8xbf16>, vector<8x8xf32> -> vector<8x8xf32>
    %163 = vector.extract_strided_slice %133 {offsets = [0, 8], sizes = [8, 8], strides = [1, 1]} : vector<8x32xf32> to vector<8x8xf32>
    %164 = arith.truncf %163 : vector<8x8xf32> to vector<8x8xbf16>
    %165 = vector.extract_strided_slice %137 {offsets = [0, 8], sizes = [8, 8], strides = [1, 1]} : vector<8x32xf32> to vector<8x8xf32>
    %166 = arith.truncf %165 : vector<8x8xf32> to vector<8x8xbf16>
    %167 = vector.extract_strided_slice %138 {offsets = [0, 8], sizes = [8, 8], strides = [1, 1]} : vector<8x32xf32> to vector<8x8xf32>
    %168 = arith.truncf %167 : vector<8x8xf32> to vector<8x8xbf16>
    %cst_56 = arith.constant dense<0.000000e+00> : vector<8x8xf32>
    %169 = tpu.matmul %164, %166, %cst_56 {dimension_numbers = #tpu.dot_dimension_numbers<[1], [1], [0], [0], [0, 0, 1, 0], [], []>} : vector<8x8xbf16>, vector<8x8xbf16>, vector<8x8xf32> -> vector<8x8xf32>
    %170 = vector.broadcast %141 : vector<1x8xf32> to vector<8x8xf32>
    %171 = arith.addf %169, %170 : vector<8x8xf32>
    %cst_57 = arith.constant dense<0xFF800000> : vector<8xf32>
    %172 = vector.multi_reduction <maximumf>, %171, %cst_57 [1] : vector<8x8xf32> to vector<8xf32>
    %173 = vector.shape_cast %172 : vector<8xf32> to vector<8x1xf32>
    %174 = vector.broadcast %173 : vector<8x1xf32> to vector<8x8xf32>
    %175 = arith.subf %171, %174 : vector<8x8xf32>
    %176 = math.exp %175 : vector<8x8xf32>
    %cst_58 = arith.constant dense<0.000000e+00> : vector<8xf32>
    %177 = vector.multi_reduction <add>, %176, %cst_58 [1] : vector<8x8xf32> to vector<8xf32>
    %178 = vector.shape_cast %177 : vector<8xf32> to vector<8x1xf32>
    %179 = tpu.reciprocal %178 {approx = true} : vector<8x1xf32> -> vector<8x1xf32>
    %180 = vector.broadcast %179 : vector<8x1xf32> to vector<8x8xf32>
    %181 = arith.mulf %176, %180 : vector<8x8xf32>
    %182 = arith.truncf %181 : vector<8x8xf32> to vector<8x8xbf16>
    %cst_59 = arith.constant dense<0.000000e+00> : vector<8x8xf32>
    %183 = tpu.matmul %182, %168, %cst_59 {dimension_numbers = #tpu.dot_dimension_numbers<[1], [0], [0], [1], [0, 0, 1, 1], [], []>} : vector<8x8xbf16>, vector<8x8xbf16>, vector<8x8xf32> -> vector<8x8xf32>
    %184 = vector.extract_strided_slice %133 {offsets = [0, 16], sizes = [8, 8], strides = [1, 1]} : vector<8x32xf32> to vector<8x8xf32>
    %185 = arith.truncf %184 : vector<8x8xf32> to vector<8x8xbf16>
    %186 = vector.extract_strided_slice %137 {offsets = [0, 16], sizes = [8, 8], strides = [1, 1]} : vector<8x32xf32> to vector<8x8xf32>
    %187 = arith.truncf %186 : vector<8x8xf32> to vector<8x8xbf16>
    %188 = vector.extract_strided_slice %138 {offsets = [0, 16], sizes = [8, 8], strides = [1, 1]} : vector<8x32xf32> to vector<8x8xf32>
    %189 = arith.truncf %188 : vector<8x8xf32> to vector<8x8xbf16>
    %cst_60 = arith.constant dense<0.000000e+00> : vector<8x8xf32>
    %190 = tpu.matmul %185, %187, %cst_60 {dimension_numbers = #tpu.dot_dimension_numbers<[1], [1], [0], [0], [0, 0, 1, 0], [], []>} : vector<8x8xbf16>, vector<8x8xbf16>, vector<8x8xf32> -> vector<8x8xf32>
    %191 = vector.broadcast %141 : vector<1x8xf32> to vector<8x8xf32>
    %192 = arith.addf %190, %191 : vector<8x8xf32>
    %cst_61 = arith.constant dense<0xFF800000> : vector<8xf32>
    %193 = vector.multi_reduction <maximumf>, %192, %cst_61 [1] : vector<8x8xf32> to vector<8xf32>
    %194 = vector.shape_cast %193 : vector<8xf32> to vector<8x1xf32>
    %195 = vector.broadcast %194 : vector<8x1xf32> to vector<8x8xf32>
    %196 = arith.subf %192, %195 : vector<8x8xf32>
    %197 = math.exp %196 : vector<8x8xf32>
    %cst_62 = arith.constant dense<0.000000e+00> : vector<8xf32>
    %198 = vector.multi_reduction <add>, %197, %cst_62 [1] : vector<8x8xf32> to vector<8xf32>
    %199 = vector.shape_cast %198 : vector<8xf32> to vector<8x1xf32>
    %200 = tpu.reciprocal %199 {approx = true} : vector<8x1xf32> -> vector<8x1xf32>
    %201 = vector.broadcast %200 : vector<8x1xf32> to vector<8x8xf32>
    %202 = arith.mulf %197, %201 : vector<8x8xf32>
    %203 = arith.truncf %202 : vector<8x8xf32> to vector<8x8xbf16>
    %cst_63 = arith.constant dense<0.000000e+00> : vector<8x8xf32>
    %204 = tpu.matmul %203, %189, %cst_63 {dimension_numbers = #tpu.dot_dimension_numbers<[1], [0], [0], [1], [0, 0, 1, 1], [], []>} : vector<8x8xbf16>, vector<8x8xbf16>, vector<8x8xf32> -> vector<8x8xf32>
    %205 = vector.extract_strided_slice %133 {offsets = [0, 24], sizes = [8, 8], strides = [1, 1]} : vector<8x32xf32> to vector<8x8xf32>
    %206 = arith.truncf %205 : vector<8x8xf32> to vector<8x8xbf16>
    %207 = vector.extract_strided_slice %137 {offsets = [0, 24], sizes = [8, 8], strides = [1, 1]} : vector<8x32xf32> to vector<8x8xf32>
    %208 = arith.truncf %207 : vector<8x8xf32> to vector<8x8xbf16>
    %209 = vector.extract_strided_slice %138 {offsets = [0, 24], sizes = [8, 8], strides = [1, 1]} : vector<8x32xf32> to vector<8x8xf32>
    %210 = arith.truncf %209 : vector<8x8xf32> to vector<8x8xbf16>
    %cst_64 = arith.constant dense<0.000000e+00> : vector<8x8xf32>
    %211 = tpu.matmul %206, %208, %cst_64 {dimension_numbers = #tpu.dot_dimension_numbers<[1], [1], [0], [0], [0, 0, 1, 0], [], []>} : vector<8x8xbf16>, vector<8x8xbf16>, vector<8x8xf32> -> vector<8x8xf32>
    %212 = vector.broadcast %141 : vector<1x8xf32> to vector<8x8xf32>
    %213 = arith.addf %211, %212 : vector<8x8xf32>
    %cst_65 = arith.constant dense<0xFF800000> : vector<8xf32>
    %214 = vector.multi_reduction <maximumf>, %213, %cst_65 [1] : vector<8x8xf32> to vector<8xf32>
    %215 = vector.shape_cast %214 : vector<8xf32> to vector<8x1xf32>
    %216 = vector.broadcast %215 : vector<8x1xf32> to vector<8x8xf32>
    %217 = arith.subf %213, %216 : vector<8x8xf32>
    %218 = math.exp %217 : vector<8x8xf32>
    %cst_66 = arith.constant dense<0.000000e+00> : vector<8xf32>
    %219 = vector.multi_reduction <add>, %218, %cst_66 [1] : vector<8x8xf32> to vector<8xf32>
    %220 = vector.shape_cast %219 : vector<8xf32> to vector<8x1xf32>
    %221 = tpu.reciprocal %220 {approx = true} : vector<8x1xf32> -> vector<8x1xf32>
    %222 = vector.broadcast %221 : vector<8x1xf32> to vector<8x8xf32>
    %223 = arith.mulf %218, %222 : vector<8x8xf32>
    %224 = arith.truncf %223 : vector<8x8xf32> to vector<8x8xbf16>
    %cst_67 = arith.constant dense<0.000000e+00> : vector<8x8xf32>
    %225 = tpu.matmul %224, %210, %cst_67 {dimension_numbers = #tpu.dot_dimension_numbers<[1], [0], [0], [1], [0, 0, 1, 1], [], []>} : vector<8x8xbf16>, vector<8x8xbf16>, vector<8x8xf32> -> vector<8x8xf32>
    %226 = tpu.concatenate %162, %183, %204, %225 in 1 : vector<8x8xf32>, vector<8x8xf32>, vector<8x8xf32>, vector<8x8xf32> -> vector<8x32xf32>
    %227 = arith.truncf %226 : vector<8x32xf32> to vector<8x32xbf16>
    %cst_68 = arith.constant dense<0.000000e+00> : vector<8x32xf32>
    %228 = tpu.matmul %227, %139, %cst_68 {dimension_numbers = #tpu.dot_dimension_numbers<[1], [0], [0], [1], [0, 0, 1, 1], [], []>} : vector<8x32xbf16>, vector<32x32xbf16>, vector<8x32xf32> -> vector<8x32xf32>
    %229 = arith.addf %117, %228 : vector<8x32xf32>
    %c0_69 = arith.constant 0 : index
    %c0_70 = arith.constant 0 : index
    %230 = vector.load %arg12[%c0_69, %c0_70] : memref<1x32xf32, #tpu.memory_space<vmem>>, vector<1x32xf32>
    %c0_71 = arith.constant 0 : index
    %c0_72 = arith.constant 0 : index
    %231 = vector.load %arg13[%c0_71, %c0_72] : memref<32x64xbf16, #tpu.memory_space<vmem>>, vector<32x64xbf16>
    %c0_73 = arith.constant 0 : index
    %c0_74 = arith.constant 0 : index
    %232 = vector.load %arg14[%c0_73, %c0_74] : memref<32x64xbf16, #tpu.memory_space<vmem>>, vector<32x64xbf16>
    %c0_75 = arith.constant 0 : index
    %c0_76 = arith.constant 0 : index
    %233 = vector.load %arg15[%c0_75, %c0_76] : memref<64x32xbf16, #tpu.memory_space<vmem>>, vector<64x32xbf16>
    %234 = arith.mulf %229, %229 : vector<8x32xf32>
    %cst_77 = arith.constant dense<0.000000e+00> : vector<8xf32>
    %235 = vector.multi_reduction <add>, %234, %cst_77 [1] : vector<8x32xf32> to vector<8xf32>
    %236 = vector.shape_cast %235 : vector<8xf32> to vector<8x1xf32>
    %cst_78 = arith.constant 3.200000e+01 : f32
    %237 = vector.broadcast %cst_78 : f32 to vector<8x1xf32>
    %238 = arith.divf %236, %237 : vector<8x1xf32>
    %cst_79 = arith.constant 9.99999997E-7 : f32
    %239 = vector.broadcast %cst_79 : f32 to vector<8x1xf32>
    %240 = arith.addf %238, %239 : vector<8x1xf32>
    %241 = math.rsqrt %240 : vector<8x1xf32>
    %242 = vector.broadcast %241 : vector<8x1xf32> to vector<8x32xf32>
    %243 = arith.mulf %229, %242 : vector<8x32xf32>
    %244 = vector.broadcast %230 : vector<1x32xf32> to vector<8x32xf32>
    %245 = arith.mulf %243, %244 : vector<8x32xf32>
    %246 = arith.truncf %245 : vector<8x32xf32> to vector<8x32xbf16>
    %cst_80 = arith.constant dense<0.000000e+00> : vector<8x64xf32>
    %247 = tpu.matmul %246, %231, %cst_80 {dimension_numbers = #tpu.dot_dimension_numbers<[1], [0], [0], [1], [0, 0, 1, 1], [], []>} : vector<8x32xbf16>, vector<32x64xbf16>, vector<8x64xf32> -> vector<8x64xf32>
    %248 = arith.mulf %247, %247 : vector<8x64xf32>
    %249 = arith.mulf %247, %248 : vector<8x64xf32>
    %cst_81 = arith.constant 4.471500e-02 : f32
    %250 = vector.broadcast %cst_81 : f32 to vector<8x64xf32>
    %251 = arith.mulf %250, %249 : vector<8x64xf32>
    %252 = arith.addf %247, %251 : vector<8x64xf32>
    %cst_82 = arith.constant 0.797884583 : f32
    %253 = vector.broadcast %cst_82 : f32 to vector<8x64xf32>
    %254 = arith.mulf %253, %252 : vector<8x64xf32>
    %255 = math.tanh %254 : vector<8x64xf32>
    %cst_83 = arith.constant 1.000000e+00 : f32
    %256 = vector.broadcast %cst_83 : f32 to vector<8x64xf32>
    %257 = arith.addf %256, %255 : vector<8x64xf32>
    %cst_84 = arith.constant 5.000000e-01 : f32
    %258 = vector.broadcast %cst_84 : f32 to vector<8x64xf32>
    %259 = arith.mulf %258, %257 : vector<8x64xf32>
    %260 = arith.mulf %247, %259 : vector<8x64xf32>
    %cst_85 = arith.constant dense<0.000000e+00> : vector<8x64xf32>
    %261 = tpu.matmul %246, %232, %cst_85 {dimension_numbers = #tpu.dot_dimension_numbers<[1], [0], [0], [1], [0, 0, 1, 1], [], []>} : vector<8x32xbf16>, vector<32x64xbf16>, vector<8x64xf32> -> vector<8x64xf32>
    %262 = arith.mulf %260, %261 : vector<8x64xf32>
    %263 = arith.truncf %262 : vector<8x64xf32> to vector<8x64xbf16>
    %cst_86 = arith.constant dense<0.000000e+00> : vector<8x32xf32>
    %264 = tpu.matmul %263, %233, %cst_86 {dimension_numbers = #tpu.dot_dimension_numbers<[1], [0], [0], [1], [0, 0, 1, 1], [], []>} : vector<8x64xbf16>, vector<64x32xbf16>, vector<8x32xf32> -> vector<8x32xf32>
    %265 = arith.addf %229, %264 : vector<8x32xf32>
    %c0_87 = arith.constant 0 : index
    %c0_88 = arith.constant 0 : index
    %266 = vector.load %arg16[%c0_87, %c0_88] : memref<1x32xf32, #tpu.memory_space<vmem>>, vector<1x32xf32>
    %267 = arith.mulf %265, %265 : vector<8x32xf32>
    %cst_89 = arith.constant dense<0.000000e+00> : vector<8xf32>
    %268 = vector.multi_reduction <add>, %267, %cst_89 [1] : vector<8x32xf32> to vector<8xf32>
    %269 = vector.shape_cast %268 : vector<8xf32> to vector<8x1xf32>
    %cst_90 = arith.constant 3.200000e+01 : f32
    %270 = vector.broadcast %cst_90 : f32 to vector<8x1xf32>
    %271 = arith.divf %269, %270 : vector<8x1xf32>
    %cst_91 = arith.constant 9.99999997E-7 : f32
    %272 = vector.broadcast %cst_91 : f32 to vector<8x1xf32>
    %273 = arith.addf %271, %272 : vector<8x1xf32>
    %274 = math.rsqrt %273 : vector<8x1xf32>
    %275 = vector.broadcast %274 : vector<8x1xf32> to vector<8x32xf32>
    %276 = arith.mulf %265, %275 : vector<8x32xf32>
    %277 = vector.broadcast %266 : vector<1x32xf32> to vector<8x32xf32>
    %278 = arith.mulf %276, %277 : vector<8x32xf32>
    %c0_92 = arith.constant 0 : index
    %c0_93 = arith.constant 0 : index
    %c0_94 = arith.constant 0 : index
    %279 = vector.load %arg17[%c0_92, %c0_93, %c0_94] : memref<1x8x32xf32, #tpu.memory_space<vmem>>, vector<1x8x32xf32>
    %280 = vector.shape_cast %279 : vector<1x8x32xf32> to vector<8x32xf32>
    %281 = vector.shape_cast %278 : vector<8x32xf32> to vector<1x8x32xf32>
    tpu.vector_store %arg17[%c0_92, %c0_93, %c0_94], %281 {strides = array<i32>} : memref<1x8x32xf32, #tpu.memory_space<vmem>>, vector<1x8x32xf32>,
    return
  }
  func.func @transform_0(%arg0: i32) -> (i32, i32, i32) {
    %c0_i32 = arith.constant 0 : i32
    %c0_i32_0 = arith.constant 0 : i32
    %c0_i32_1 = arith.constant 0 : i32
    return %arg0, %c0_i32, %c0_i32_0 : i32, i32, i32
  }
  func.func @transform_1(%arg0: i32) -> (i32, i32, i32) {
    %c0_i32 = arith.constant 0 : i32
    %c0_i32_0 = arith.constant 0 : i32
    %c0_i32_1 = arith.constant 0 : i32
    return %arg0, %c0_i32, %c0_i32_0 : i32, i32, i32
  }
  func.func @transform_2(%arg0: i32) -> (i32, i32, i32) {
    %c0_i32 = arith.constant 0 : i32
    %c0_i32_0 = arith.constant 0 : i32
    %c0_i32_1 = arith.constant 0 : i32
    return %arg0, %c0_i32, %c0_i32_0 : i32, i32, i32
  }
  func.func @transform_3(%arg0: i32) -> (i32, i32, i32) {
    %c0_i32 = arith.constant 0 : i32
    %c0_i32_0 = arith.constant 0 : i32
    %c0_i32_1 = arith.constant 0 : i32
    return %arg0, %c0_i32, %c0_i32_0 : i32, i32, i32
  }
  func.func @transform_4(%arg0: i32) -> (i32, i32) {
    %c0_i32 = arith.constant 0 : i32
    %c0_i32_0 = arith.constant 0 : i32
    %c0_i32_1 = arith.constant 0 : i32
    return %c0_i32, %c0_i32_0 : i32, i32
  }
  func.func @transform_5(%arg0: i32) -> (i32, i32) {
    %c0_i32 = arith.constant 0 : i32
    %c0_i32_0 = arith.constant 0 : i32
    %c0_i32_1 = arith.constant 0 : i32
    return %c0_i32, %c0_i32_0 : i32, i32
  }
  func.func @transform_6(%arg0: i32) -> (i32, i32) {
    %c0_i32 = arith.constant 0 : i32
    %c0_i32_0 = arith.constant 0 : i32
    %c0_i32_1 = arith.constant 0 : i32
    return %c0_i32, %c0_i32_0 : i32, i32
  }
  func.func @transform_7(%arg0: i32) -> (i32, i32) {
    %c0_i32 = arith.constant 0 : i32
    %c0_i32_0 = arith.constant 0 : i32
    %c0_i32_1 = arith.constant 0 : i32
    return %c0_i32, %c0_i32_0 : i32, i32
  }
  func.func @transform_8(%arg0: i32) -> (i32, i32) {
    %c0_i32 = arith.constant 0 : i32
    %c0_i32_0 = arith.constant 0 : i32
    %c0_i32_1 = arith.constant 0 : i32
    return %c0_i32, %c0_i32_0 : i32, i32
  }
  func.func @transform_9(%arg0: i32) -> (i32, i32) {
    %c0_i32 = arith.constant 0 : i32
    %c0_i32_0 = arith.constant 0 : i32
    %c0_i32_1 = arith.constant 0 : i32
    return %c0_i32, %c0_i32_0 : i32, i32
  }
  func.func @transform_10(%arg0: i32) -> (i32, i32) {
    %c0_i32 = arith.constant 0 : i32
    %c0_i32_0 = arith.constant 0 : i32
    %c0_i32_1 = arith.constant 0 : i32
    return %c0_i32, %c0_i32_0 : i32, i32
  }
  func.func @transform_11(%arg0: i32) -> (i32, i32) {
    %c0_i32 = arith.constant 0 : i32
    %c0_i32_0 = arith.constant 0 : i32
    %c0_i32_1 = arith.constant 0 : i32
    return %c0_i32, %c0_i32_0 : i32, i32
  }
  func.func @transform_12(%arg0: i32) -> (i32, i32) {
    %c0_i32 = arith.constant 0 : i32
    %c0_i32_0 = arith.constant 0 : i32
    %c0_i32_1 = arith.constant 0 : i32
    return %c0_i32, %c0_i32_0 : i32, i32
  }
  func.func @transform_13(%arg0: i32) -> (i32, i32) {
    %c0_i32 = arith.constant 0 : i32
    %c0_i32_0 = arith.constant 0 : i32
    %c0_i32_1 = arith.constant 0 : i32
    return %c0_i32, %c0_i32_0 : i32, i32
  }
  func.func @transform_14(%arg0: i32) -> (i32, i32) {
    %c0_i32 = arith.constant 0 : i32
    %c0_i32_0 = arith.constant 0 : i32
    %c0_i32_1 = arith.constant 0 : i32
    return %c0_i32, %c0_i32_0 : i32, i32
  }
  func.func @transform_15(%arg0: i32) -> (i32, i32) {
    %c0_i32 = arith.constant 0 : i32
    %c0_i32_0 = arith.constant 0 : i32
    %c0_i32_1 = arith.constant 0 : i32
    return %c0_i32, %c0_i32_0 : i32, i32
  }
  func.func @transform_16(%arg0: i32) -> (i32, i32, i32) {
    %c0_i32 = arith.constant 0 : i32
    %c0_i32_0 = arith.constant 0 : i32
    %c0_i32_1 = arith.constant 0 : i32
    return %arg0, %c0_i32, %c0_i32_0 : i32, i32, i32
  }
}

module attributes {stable_mosaic.version = 11 : i64} {
  func.func @_encoder_block_kernel(%arg0: i32, %arg1: memref<1x8x32xf32, #tpu.memory_space<vmem>>, %arg2: memref<1x1x8xf32, #tpu.memory_space<vmem>>, %arg3: memref<1x32xf32, #tpu.memory_space<vmem>>, %arg4: memref<32x96xbf16, #tpu.memory_space<vmem>>, %arg5: memref<32x32xbf16, #tpu.memory_space<vmem>>, %arg6: memref<1x32xf32, #tpu.memory_space<vmem>>, %arg7: memref<32x64xbf16, #tpu.memory_space<vmem>>, %arg8: memref<32x64xbf16, #tpu.memory_space<vmem>>, %arg9: memref<64x32xbf16, #tpu.memory_space<vmem>>, %arg10: memref<1x32xf32, #tpu.memory_space<vmem>>, %arg11: memref<1x8x32xf32, #tpu.memory_space<vmem>>) attributes {dimension_semantics = [#tpu.dimension_semantics<parallel>], iteration_bounds = array<i64: 2>, scalar_prefetch = 0 : i64, scratch_operands = 0 : i64, tpu.core_type = #tpu.core_type<tc>, window_params = [{transform_indices = @transform_0, window_bounds = array<i64: 1, 8, 32>}, {transform_indices = @transform_1, window_bounds = array<i64: 1, 1, 8>}, {pipeline_mode = #tpu.pipeline_mode<synchronous>, transform_indices = @transform_2, window_bounds = array<i64: 1, 32>}, {pipeline_mode = #tpu.pipeline_mode<synchronous>, transform_indices = @transform_3, window_bounds = array<i64: 32, 96>}, {pipeline_mode = #tpu.pipeline_mode<synchronous>, transform_indices = @transform_4, window_bounds = array<i64: 32, 32>}, {pipeline_mode = #tpu.pipeline_mode<synchronous>, transform_indices = @transform_5, window_bounds = array<i64: 1, 32>}, {pipeline_mode = #tpu.pipeline_mode<synchronous>, transform_indices = @transform_6, window_bounds = array<i64: 32, 64>}, {pipeline_mode = #tpu.pipeline_mode<synchronous>, transform_indices = @transform_7, window_bounds = array<i64: 32, 64>}, {pipeline_mode = #tpu.pipeline_mode<synchronous>, transform_indices = @transform_8, window_bounds = array<i64: 64, 32>}, {pipeline_mode = #tpu.pipeline_mode<synchronous>, transform_indices = @transform_9, window_bounds = array<i64: 1, 32>}, {transform_indices = @transform_10, window_bounds = array<i64: 1, 8, 32>}]} {
    %c0 = arith.constant 0 : index
    %c0_0 = arith.constant 0 : index
    %c0_1 = arith.constant 0 : index
    %0 = vector.load %arg1[%c0, %c0_0, %c0_1] : memref<1x8x32xf32, #tpu.memory_space<vmem>>, vector<1x8x32xf32>
    %1 = vector.shape_cast %0 : vector<1x8x32xf32> to vector<8x32xf32>
    %c0_2 = arith.constant 0 : index
    %c0_3 = arith.constant 0 : index
    %c0_4 = arith.constant 0 : index
    %2 = vector.load %arg2[%c0_2, %c0_3, %c0_4] : memref<1x1x8xf32, #tpu.memory_space<vmem>>, vector<1x1x8xf32>
    %3 = vector.shape_cast %2 : vector<1x1x8xf32> to vector<1x8xf32>
    %c0_5 = arith.constant 0 : index
    %c0_6 = arith.constant 0 : index
    %4 = vector.load %arg3[%c0_5, %c0_6] : memref<1x32xf32, #tpu.memory_space<vmem>>, vector<1x32xf32>
    %5 = arith.mulf %1, %1 : vector<8x32xf32>
    %cst = arith.constant dense<0.000000e+00> : vector<8xf32>
    %6 = vector.multi_reduction <add>, %5, %cst [1] : vector<8x32xf32> to vector<8xf32>
    %7 = vector.shape_cast %6 : vector<8xf32> to vector<8x1xf32>
    %cst_7 = arith.constant 3.200000e+01 : f32
    %8 = vector.broadcast %cst_7 : f32 to vector<8x1xf32>
    %9 = arith.divf %7, %8 : vector<8x1xf32>
    %cst_8 = arith.constant 9.99999997E-7 : f32
    %10 = vector.broadcast %cst_8 : f32 to vector<8x1xf32>
    %11 = arith.addf %9, %10 : vector<8x1xf32>
    %12 = math.rsqrt %11 : vector<8x1xf32>
    %13 = vector.broadcast %12 : vector<8x1xf32> to vector<8x32xf32>
    %14 = arith.mulf %1, %13 : vector<8x32xf32>
    %15 = vector.broadcast %4 : vector<1x32xf32> to vector<8x32xf32>
    %16 = arith.mulf %14, %15 : vector<8x32xf32>
    %17 = arith.truncf %16 : vector<8x32xf32> to vector<8x32xbf16>
    %c0_9 = arith.constant 0 : index
    %c0_10 = arith.constant 0 : index
    %18 = vector.load %arg4[%c0_9, %c0_10] : memref<32x96xbf16, #tpu.memory_space<vmem>>, vector<32x96xbf16>
    %cst_11 = arith.constant dense<0.000000e+00> : vector<8x96xf32>
    %19 = tpu.matmul %17, %18, %cst_11 {dimension_numbers = #tpu.dot_dimension_numbers<[1], [0], [0], [1], [0, 0, 1, 1], [], []>} : vector<8x32xbf16>, vector<32x96xbf16>, vector<8x96xf32> -> vector<8x96xf32>
    %20 = vector.extract_strided_slice %19 {offsets = [0, 0], sizes = [8, 32], strides = [1, 1]} : vector<8x96xf32> to vector<8x32xf32>
    %21 = vector.extract_strided_slice %19 {offsets = [0, 32], sizes = [8, 32], strides = [1, 1]} : vector<8x96xf32> to vector<8x32xf32>
    %22 = vector.extract_strided_slice %19 {offsets = [0, 64], sizes = [8, 32], strides = [1, 1]} : vector<8x96xf32> to vector<8x32xf32>
    %c0_12 = arith.constant 0 : index
    %c0_13 = arith.constant 0 : index
    %23 = vector.load %arg5[%c0_12, %c0_13] : memref<32x32xbf16, #tpu.memory_space<vmem>>, vector<32x32xbf16>
    %24 = vector.extract_strided_slice %20 {offsets = [0, 0], sizes = [8, 8], strides = [1, 1]} : vector<8x32xf32> to vector<8x8xf32>
    %25 = arith.truncf %24 : vector<8x8xf32> to vector<8x8xbf16>
    %26 = vector.extract_strided_slice %21 {offsets = [0, 0], sizes = [8, 8], strides = [1, 1]} : vector<8x32xf32> to vector<8x8xf32>
    %27 = arith.truncf %26 : vector<8x8xf32> to vector<8x8xbf16>
    %28 = vector.extract_strided_slice %22 {offsets = [0, 0], sizes = [8, 8], strides = [1, 1]} : vector<8x32xf32> to vector<8x8xf32>
    %29 = arith.truncf %28 : vector<8x8xf32> to vector<8x8xbf16>
    %cst_14 = arith.constant dense<0.000000e+00> : vector<8x8xf32>
    %30 = tpu.matmul %25, %27, %cst_14 {dimension_numbers = #tpu.dot_dimension_numbers<[1], [1], [0], [0], [0, 0, 1, 0], [], []>} : vector<8x8xbf16>, vector<8x8xbf16>, vector<8x8xf32> -> vector<8x8xf32>
    %31 = vector.broadcast %3 : vector<1x8xf32> to vector<8x8xf32>
    %32 = arith.addf %30, %31 : vector<8x8xf32>
    %cst_15 = arith.constant dense<0xFF800000> : vector<8xf32>
    %33 = vector.multi_reduction <maximumf>, %32, %cst_15 [1] : vector<8x8xf32> to vector<8xf32>
    %34 = vector.shape_cast %33 : vector<8xf32> to vector<8x1xf32>
    %35 = vector.broadcast %34 : vector<8x1xf32> to vector<8x8xf32>
    %36 = arith.subf %32, %35 : vector<8x8xf32>
    %37 = math.exp %36 : vector<8x8xf32>
    %cst_16 = arith.constant dense<0.000000e+00> : vector<8xf32>
    %38 = vector.multi_reduction <add>, %37, %cst_16 [1] : vector<8x8xf32> to vector<8xf32>
    %39 = vector.shape_cast %38 : vector<8xf32> to vector<8x1xf32>
    %40 = tpu.reciprocal %39 {approx = true} : vector<8x1xf32> -> vector<8x1xf32>
    %41 = vector.broadcast %40 : vector<8x1xf32> to vector<8x8xf32>
    %42 = arith.mulf %37, %41 : vector<8x8xf32>
    %43 = arith.truncf %42 : vector<8x8xf32> to vector<8x8xbf16>
    %cst_17 = arith.constant dense<0.000000e+00> : vector<8x8xf32>
    %44 = tpu.matmul %43, %29, %cst_17 {dimension_numbers = #tpu.dot_dimension_numbers<[1], [0], [0], [1], [0, 0, 1, 1], [], []>} : vector<8x8xbf16>, vector<8x8xbf16>, vector<8x8xf32> -> vector<8x8xf32>
    %45 = vector.extract_strided_slice %20 {offsets = [0, 8], sizes = [8, 8], strides = [1, 1]} : vector<8x32xf32> to vector<8x8xf32>
    %46 = arith.truncf %45 : vector<8x8xf32> to vector<8x8xbf16>
    %47 = vector.extract_strided_slice %21 {offsets = [0, 8], sizes = [8, 8], strides = [1, 1]} : vector<8x32xf32> to vector<8x8xf32>
    %48 = arith.truncf %47 : vector<8x8xf32> to vector<8x8xbf16>
    %49 = vector.extract_strided_slice %22 {offsets = [0, 8], sizes = [8, 8], strides = [1, 1]} : vector<8x32xf32> to vector<8x8xf32>
    %50 = arith.truncf %49 : vector<8x8xf32> to vector<8x8xbf16>
    %cst_18 = arith.constant dense<0.000000e+00> : vector<8x8xf32>
    %51 = tpu.matmul %46, %48, %cst_18 {dimension_numbers = #tpu.dot_dimension_numbers<[1], [1], [0], [0], [0, 0, 1, 0], [], []>} : vector<8x8xbf16>, vector<8x8xbf16>, vector<8x8xf32> -> vector<8x8xf32>
    %52 = vector.broadcast %3 : vector<1x8xf32> to vector<8x8xf32>
    %53 = arith.addf %51, %52 : vector<8x8xf32>
    %cst_19 = arith.constant dense<0xFF800000> : vector<8xf32>
    %54 = vector.multi_reduction <maximumf>, %53, %cst_19 [1] : vector<8x8xf32> to vector<8xf32>
    %55 = vector.shape_cast %54 : vector<8xf32> to vector<8x1xf32>
    %56 = vector.broadcast %55 : vector<8x1xf32> to vector<8x8xf32>
    %57 = arith.subf %53, %56 : vector<8x8xf32>
    %58 = math.exp %57 : vector<8x8xf32>
    %cst_20 = arith.constant dense<0.000000e+00> : vector<8xf32>
    %59 = vector.multi_reduction <add>, %58, %cst_20 [1] : vector<8x8xf32> to vector<8xf32>
    %60 = vector.shape_cast %59 : vector<8xf32> to vector<8x1xf32>
    %61 = tpu.reciprocal %60 {approx = true} : vector<8x1xf32> -> vector<8x1xf32>
    %62 = vector.broadcast %61 : vector<8x1xf32> to vector<8x8xf32>
    %63 = arith.mulf %58, %62 : vector<8x8xf32>
    %64 = arith.truncf %63 : vector<8x8xf32> to vector<8x8xbf16>
    %cst_21 = arith.constant dense<0.000000e+00> : vector<8x8xf32>
    %65 = tpu.matmul %64, %50, %cst_21 {dimension_numbers = #tpu.dot_dimension_numbers<[1], [0], [0], [1], [0, 0, 1, 1], [], []>} : vector<8x8xbf16>, vector<8x8xbf16>, vector<8x8xf32> -> vector<8x8xf32>
    %66 = vector.extract_strided_slice %20 {offsets = [0, 16], sizes = [8, 8], strides = [1, 1]} : vector<8x32xf32> to vector<8x8xf32>
    %67 = arith.truncf %66 : vector<8x8xf32> to vector<8x8xbf16>
    %68 = vector.extract_strided_slice %21 {offsets = [0, 16], sizes = [8, 8], strides = [1, 1]} : vector<8x32xf32> to vector<8x8xf32>
    %69 = arith.truncf %68 : vector<8x8xf32> to vector<8x8xbf16>
    %70 = vector.extract_strided_slice %22 {offsets = [0, 16], sizes = [8, 8], strides = [1, 1]} : vector<8x32xf32> to vector<8x8xf32>
    %71 = arith.truncf %70 : vector<8x8xf32> to vector<8x8xbf16>
    %cst_22 = arith.constant dense<0.000000e+00> : vector<8x8xf32>
    %72 = tpu.matmul %67, %69, %cst_22 {dimension_numbers = #tpu.dot_dimension_numbers<[1], [1], [0], [0], [0, 0, 1, 0], [], []>} : vector<8x8xbf16>, vector<8x8xbf16>, vector<8x8xf32> -> vector<8x8xf32>
    %73 = vector.broadcast %3 : vector<1x8xf32> to vector<8x8xf32>
    %74 = arith.addf %72, %73 : vector<8x8xf32>
    %cst_23 = arith.constant dense<0xFF800000> : vector<8xf32>
    %75 = vector.multi_reduction <maximumf>, %74, %cst_23 [1] : vector<8x8xf32> to vector<8xf32>
    %76 = vector.shape_cast %75 : vector<8xf32> to vector<8x1xf32>
    %77 = vector.broadcast %76 : vector<8x1xf32> to vector<8x8xf32>
    %78 = arith.subf %74, %77 : vector<8x8xf32>
    %79 = math.exp %78 : vector<8x8xf32>
    %cst_24 = arith.constant dense<0.000000e+00> : vector<8xf32>
    %80 = vector.multi_reduction <add>, %79, %cst_24 [1] : vector<8x8xf32> to vector<8xf32>
    %81 = vector.shape_cast %80 : vector<8xf32> to vector<8x1xf32>
    %82 = tpu.reciprocal %81 {approx = true} : vector<8x1xf32> -> vector<8x1xf32>
    %83 = vector.broadcast %82 : vector<8x1xf32> to vector<8x8xf32>
    %84 = arith.mulf %79, %83 : vector<8x8xf32>
    %85 = arith.truncf %84 : vector<8x8xf32> to vector<8x8xbf16>
    %cst_25 = arith.constant dense<0.000000e+00> : vector<8x8xf32>
    %86 = tpu.matmul %85, %71, %cst_25 {dimension_numbers = #tpu.dot_dimension_numbers<[1], [0], [0], [1], [0, 0, 1, 1], [], []>} : vector<8x8xbf16>, vector<8x8xbf16>, vector<8x8xf32> -> vector<8x8xf32>
    %87 = vector.extract_strided_slice %20 {offsets = [0, 24], sizes = [8, 8], strides = [1, 1]} : vector<8x32xf32> to vector<8x8xf32>
    %88 = arith.truncf %87 : vector<8x8xf32> to vector<8x8xbf16>
    %89 = vector.extract_strided_slice %21 {offsets = [0, 24], sizes = [8, 8], strides = [1, 1]} : vector<8x32xf32> to vector<8x8xf32>
    %90 = arith.truncf %89 : vector<8x8xf32> to vector<8x8xbf16>
    %91 = vector.extract_strided_slice %22 {offsets = [0, 24], sizes = [8, 8], strides = [1, 1]} : vector<8x32xf32> to vector<8x8xf32>
    %92 = arith.truncf %91 : vector<8x8xf32> to vector<8x8xbf16>
    %cst_26 = arith.constant dense<0.000000e+00> : vector<8x8xf32>
    %93 = tpu.matmul %88, %90, %cst_26 {dimension_numbers = #tpu.dot_dimension_numbers<[1], [1], [0], [0], [0, 0, 1, 0], [], []>} : vector<8x8xbf16>, vector<8x8xbf16>, vector<8x8xf32> -> vector<8x8xf32>
    %94 = vector.broadcast %3 : vector<1x8xf32> to vector<8x8xf32>
    %95 = arith.addf %93, %94 : vector<8x8xf32>
    %cst_27 = arith.constant dense<0xFF800000> : vector<8xf32>
    %96 = vector.multi_reduction <maximumf>, %95, %cst_27 [1] : vector<8x8xf32> to vector<8xf32>
    %97 = vector.shape_cast %96 : vector<8xf32> to vector<8x1xf32>
    %98 = vector.broadcast %97 : vector<8x1xf32> to vector<8x8xf32>
    %99 = arith.subf %95, %98 : vector<8x8xf32>
    %100 = math.exp %99 : vector<8x8xf32>
    %cst_28 = arith.constant dense<0.000000e+00> : vector<8xf32>
    %101 = vector.multi_reduction <add>, %100, %cst_28 [1] : vector<8x8xf32> to vector<8xf32>
    %102 = vector.shape_cast %101 : vector<8xf32> to vector<8x1xf32>
    %103 = tpu.reciprocal %102 {approx = true} : vector<8x1xf32> -> vector<8x1xf32>
    %104 = vector.broadcast %103 : vector<8x1xf32> to vector<8x8xf32>
    %105 = arith.mulf %100, %104 : vector<8x8xf32>
    %106 = arith.truncf %105 : vector<8x8xf32> to vector<8x8xbf16>
    %cst_29 = arith.constant dense<0.000000e+00> : vector<8x8xf32>
    %107 = tpu.matmul %106, %92, %cst_29 {dimension_numbers = #tpu.dot_dimension_numbers<[1], [0], [0], [1], [0, 0, 1, 1], [], []>} : vector<8x8xbf16>, vector<8x8xbf16>, vector<8x8xf32> -> vector<8x8xf32>
    %108 = tpu.concatenate %44, %65, %86, %107 in 1 : vector<8x8xf32>, vector<8x8xf32>, vector<8x8xf32>, vector<8x8xf32> -> vector<8x32xf32>
    %109 = arith.truncf %108 : vector<8x32xf32> to vector<8x32xbf16>
    %cst_30 = arith.constant dense<0.000000e+00> : vector<8x32xf32>
    %110 = tpu.matmul %109, %23, %cst_30 {dimension_numbers = #tpu.dot_dimension_numbers<[1], [0], [0], [1], [0, 0, 1, 1], [], []>} : vector<8x32xbf16>, vector<32x32xbf16>, vector<8x32xf32> -> vector<8x32xf32>
    %111 = arith.addf %1, %110 : vector<8x32xf32>
    %c0_31 = arith.constant 0 : index
    %c0_32 = arith.constant 0 : index
    %112 = vector.load %arg6[%c0_31, %c0_32] : memref<1x32xf32, #tpu.memory_space<vmem>>, vector<1x32xf32>
    %c0_33 = arith.constant 0 : index
    %c0_34 = arith.constant 0 : index
    %113 = vector.load %arg7[%c0_33, %c0_34] : memref<32x64xbf16, #tpu.memory_space<vmem>>, vector<32x64xbf16>
    %c0_35 = arith.constant 0 : index
    %c0_36 = arith.constant 0 : index
    %114 = vector.load %arg8[%c0_35, %c0_36] : memref<32x64xbf16, #tpu.memory_space<vmem>>, vector<32x64xbf16>
    %c0_37 = arith.constant 0 : index
    %c0_38 = arith.constant 0 : index
    %115 = vector.load %arg9[%c0_37, %c0_38] : memref<64x32xbf16, #tpu.memory_space<vmem>>, vector<64x32xbf16>
    %116 = arith.mulf %111, %111 : vector<8x32xf32>
    %cst_39 = arith.constant dense<0.000000e+00> : vector<8xf32>
    %117 = vector.multi_reduction <add>, %116, %cst_39 [1] : vector<8x32xf32> to vector<8xf32>
    %118 = vector.shape_cast %117 : vector<8xf32> to vector<8x1xf32>
    %cst_40 = arith.constant 3.200000e+01 : f32
    %119 = vector.broadcast %cst_40 : f32 to vector<8x1xf32>
    %120 = arith.divf %118, %119 : vector<8x1xf32>
    %cst_41 = arith.constant 9.99999997E-7 : f32
    %121 = vector.broadcast %cst_41 : f32 to vector<8x1xf32>
    %122 = arith.addf %120, %121 : vector<8x1xf32>
    %123 = math.rsqrt %122 : vector<8x1xf32>
    %124 = vector.broadcast %123 : vector<8x1xf32> to vector<8x32xf32>
    %125 = arith.mulf %111, %124 : vector<8x32xf32>
    %126 = vector.broadcast %112 : vector<1x32xf32> to vector<8x32xf32>
    %127 = arith.mulf %125, %126 : vector<8x32xf32>
    %128 = arith.truncf %127 : vector<8x32xf32> to vector<8x32xbf16>
    %cst_42 = arith.constant dense<0.000000e+00> : vector<8x64xf32>
    %129 = tpu.matmul %128, %113, %cst_42 {dimension_numbers = #tpu.dot_dimension_numbers<[1], [0], [0], [1], [0, 0, 1, 1], [], []>} : vector<8x32xbf16>, vector<32x64xbf16>, vector<8x64xf32> -> vector<8x64xf32>
    %130 = arith.mulf %129, %129 : vector<8x64xf32>
    %131 = arith.mulf %129, %130 : vector<8x64xf32>
    %cst_43 = arith.constant 4.471500e-02 : f32
    %132 = vector.broadcast %cst_43 : f32 to vector<8x64xf32>
    %133 = arith.mulf %132, %131 : vector<8x64xf32>
    %134 = arith.addf %129, %133 : vector<8x64xf32>
    %cst_44 = arith.constant 0.797884583 : f32
    %135 = vector.broadcast %cst_44 : f32 to vector<8x64xf32>
    %136 = arith.mulf %135, %134 : vector<8x64xf32>
    %137 = math.tanh %136 : vector<8x64xf32>
    %cst_45 = arith.constant 1.000000e+00 : f32
    %138 = vector.broadcast %cst_45 : f32 to vector<8x64xf32>
    %139 = arith.addf %138, %137 : vector<8x64xf32>
    %cst_46 = arith.constant 5.000000e-01 : f32
    %140 = vector.broadcast %cst_46 : f32 to vector<8x64xf32>
    %141 = arith.mulf %140, %139 : vector<8x64xf32>
    %142 = arith.mulf %129, %141 : vector<8x64xf32>
    %cst_47 = arith.constant dense<0.000000e+00> : vector<8x64xf32>
    %143 = tpu.matmul %128, %114, %cst_47 {dimension_numbers = #tpu.dot_dimension_numbers<[1], [0], [0], [1], [0, 0, 1, 1], [], []>} : vector<8x32xbf16>, vector<32x64xbf16>, vector<8x64xf32> -> vector<8x64xf32>
    %144 = arith.mulf %142, %143 : vector<8x64xf32>
    %145 = arith.truncf %144 : vector<8x64xf32> to vector<8x64xbf16>
    %cst_48 = arith.constant dense<0.000000e+00> : vector<8x32xf32>
    %146 = tpu.matmul %145, %115, %cst_48 {dimension_numbers = #tpu.dot_dimension_numbers<[1], [0], [0], [1], [0, 0, 1, 1], [], []>} : vector<8x64xbf16>, vector<64x32xbf16>, vector<8x32xf32> -> vector<8x32xf32>
    %147 = arith.addf %111, %146 : vector<8x32xf32>
    %c0_49 = arith.constant 0 : index
    %c0_50 = arith.constant 0 : index
    %148 = vector.load %arg10[%c0_49, %c0_50] : memref<1x32xf32, #tpu.memory_space<vmem>>, vector<1x32xf32>
    %149 = arith.mulf %147, %147 : vector<8x32xf32>
    %cst_51 = arith.constant dense<0.000000e+00> : vector<8xf32>
    %150 = vector.multi_reduction <add>, %149, %cst_51 [1] : vector<8x32xf32> to vector<8xf32>
    %151 = vector.shape_cast %150 : vector<8xf32> to vector<8x1xf32>
    %cst_52 = arith.constant 3.200000e+01 : f32
    %152 = vector.broadcast %cst_52 : f32 to vector<8x1xf32>
    %153 = arith.divf %151, %152 : vector<8x1xf32>
    %cst_53 = arith.constant 9.99999997E-7 : f32
    %154 = vector.broadcast %cst_53 : f32 to vector<8x1xf32>
    %155 = arith.addf %153, %154 : vector<8x1xf32>
    %156 = math.rsqrt %155 : vector<8x1xf32>
    %157 = vector.broadcast %156 : vector<8x1xf32> to vector<8x32xf32>
    %158 = arith.mulf %147, %157 : vector<8x32xf32>
    %159 = vector.broadcast %148 : vector<1x32xf32> to vector<8x32xf32>
    %160 = arith.mulf %158, %159 : vector<8x32xf32>
    %c0_54 = arith.constant 0 : index
    %c0_55 = arith.constant 0 : index
    %c0_56 = arith.constant 0 : index
    %161 = vector.load %arg11[%c0_54, %c0_55, %c0_56] : memref<1x8x32xf32, #tpu.memory_space<vmem>>, vector<1x8x32xf32>
    %162 = vector.shape_cast %161 : vector<1x8x32xf32> to vector<8x32xf32>
    %163 = vector.shape_cast %160 : vector<8x32xf32> to vector<1x8x32xf32>
    tpu.vector_store %arg11[%c0_54, %c0_55, %c0_56], %163 {strides = array<i32>} : memref<1x8x32xf32, #tpu.memory_space<vmem>>, vector<1x8x32xf32>,
    return
  }
  func.func @transform_0(%arg0: i32) -> (i32, i32, i32) {
    %c0_i32 = arith.constant 0 : i32
    %c0_i32_0 = arith.constant 0 : i32
    %c0_i32_1 = arith.constant 0 : i32
    return %arg0, %c0_i32, %c0_i32_0 : i32, i32, i32
  }
  func.func @transform_1(%arg0: i32) -> (i32, i32, i32) {
    %c0_i32 = arith.constant 0 : i32
    %c0_i32_0 = arith.constant 0 : i32
    %c0_i32_1 = arith.constant 0 : i32
    return %arg0, %c0_i32, %c0_i32_0 : i32, i32, i32
  }
  func.func @transform_2(%arg0: i32) -> (i32, i32) {
    %c0_i32 = arith.constant 0 : i32
    %c0_i32_0 = arith.constant 0 : i32
    %c0_i32_1 = arith.constant 0 : i32
    return %c0_i32, %c0_i32_0 : i32, i32
  }
  func.func @transform_3(%arg0: i32) -> (i32, i32) {
    %c0_i32 = arith.constant 0 : i32
    %c0_i32_0 = arith.constant 0 : i32
    %c0_i32_1 = arith.constant 0 : i32
    return %c0_i32, %c0_i32_0 : i32, i32
  }
  func.func @transform_4(%arg0: i32) -> (i32, i32) {
    %c0_i32 = arith.constant 0 : i32
    %c0_i32_0 = arith.constant 0 : i32
    %c0_i32_1 = arith.constant 0 : i32
    return %c0_i32, %c0_i32_0 : i32, i32
  }
  func.func @transform_5(%arg0: i32) -> (i32, i32) {
    %c0_i32 = arith.constant 0 : i32
    %c0_i32_0 = arith.constant 0 : i32
    %c0_i32_1 = arith.constant 0 : i32
    return %c0_i32, %c0_i32_0 : i32, i32
  }
  func.func @transform_6(%arg0: i32) -> (i32, i32) {
    %c0_i32 = arith.constant 0 : i32
    %c0_i32_0 = arith.constant 0 : i32
    %c0_i32_1 = arith.constant 0 : i32
    return %c0_i32, %c0_i32_0 : i32, i32
  }
  func.func @transform_7(%arg0: i32) -> (i32, i32) {
    %c0_i32 = arith.constant 0 : i32
    %c0_i32_0 = arith.constant 0 : i32
    %c0_i32_1 = arith.constant 0 : i32
    return %c0_i32, %c0_i32_0 : i32, i32
  }
  func.func @transform_8(%arg0: i32) -> (i32, i32) {
    %c0_i32 = arith.constant 0 : i32
    %c0_i32_0 = arith.constant 0 : i32
    %c0_i32_1 = arith.constant 0 : i32
    return %c0_i32, %c0_i32_0 : i32, i32
  }
  func.func @transform_9(%arg0: i32) -> (i32, i32) {
    %c0_i32 = arith.constant 0 : i32
    %c0_i32_0 = arith.constant 0 : i32
    %c0_i32_1 = arith.constant 0 : i32
    return %c0_i32, %c0_i32_0 : i32, i32
  }
  func.func @transform_10(%arg0: i32) -> (i32, i32, i32) {
    %c0_i32 = arith.constant 0 : i32
    %c0_i32_0 = arith.constant 0 : i32
    %c0_i32_1 = arith.constant 0 : i32
    return %arg0, %c0_i32, %c0_i32_0 : i32, i32, i32
  }
}

module attributes {stable_mosaic.version = 11 : i64} {
  func.func @_lm_head_kernel(%arg0: i32, %arg1: memref<16x32xf32, #tpu.memory_space<vmem>>, %arg2: memref<32x128xbf16, #tpu.memory_space<vmem>>, %arg3: memref<16x128xf32, #tpu.memory_space<vmem>>) attributes {dimension_semantics = [#tpu.dimension_semantics<parallel>], iteration_bounds = array<i64: 2>, scalar_prefetch = 0 : i64, scratch_operands = 0 : i64, tpu.core_type = #tpu.core_type<tc>, window_params = [{pipeline_mode = #tpu.pipeline_mode<synchronous>, transform_indices = @transform_0, window_bounds = array<i64: 16, 32>}, {transform_indices = @transform_1, window_bounds = array<i64: 32, 128>}, {transform_indices = @transform_2, window_bounds = array<i64: 16, 128>}]} {
    %c0 = arith.constant 0 : index
    %c0_0 = arith.constant 0 : index
    %0 = vector.load %arg1[%c0, %c0_0] : memref<16x32xf32, #tpu.memory_space<vmem>>, vector<16x32xf32>
    %1 = arith.truncf %0 : vector<16x32xf32> to vector<16x32xbf16>
    %c0_1 = arith.constant 0 : index
    %c0_2 = arith.constant 0 : index
    %2 = vector.load %arg2[%c0_1, %c0_2] : memref<32x128xbf16, #tpu.memory_space<vmem>>, vector<32x128xbf16>
    %cst = arith.constant dense<0.000000e+00> : vector<16x128xf32>
    %3 = tpu.matmul %1, %2, %cst {dimension_numbers = #tpu.dot_dimension_numbers<[1], [0], [0], [1], [0, 0, 1, 1], [], []>} : vector<16x32xbf16>, vector<32x128xbf16>, vector<16x128xf32> -> vector<16x128xf32>
    %c0_3 = arith.constant 0 : index
    %c0_4 = arith.constant 0 : index
    %4 = vector.load %arg3[%c0_3, %c0_4] : memref<16x128xf32, #tpu.memory_space<vmem>>, vector<16x128xf32>
    tpu.vector_store %arg3[%c0_3, %c0_4], %3 {strides = array<i32>} : memref<16x128xf32, #tpu.memory_space<vmem>>, vector<16x128xf32>,
    return
  }
  func.func @transform_0(%arg0: i32) -> (i32, i32) {
    %c0_i32 = arith.constant 0 : i32
    %c0_i32_0 = arith.constant 0 : i32
    %c0_i32_1 = arith.constant 0 : i32
    return %c0_i32, %c0_i32_0 : i32, i32
  }
  func.func @transform_1(%arg0: i32) -> (i32, i32) {
    %c0_i32 = arith.constant 0 : i32
    %c0_i32_0 = arith.constant 0 : i32
    return %c0_i32, %arg0 : i32, i32
  }
  func.func @transform_2(%arg0: i32) -> (i32, i32) {
    %c0_i32 = arith.constant 0 : i32
    %c0_i32_0 = arith.constant 0 : i32
    return %c0_i32, %arg0 : i32, i32
  }
}

</mosaic_0001>

<bundles_post_ra>
// kernel: t5_fine_tuner_forward.5
= control target key start
LH: loop header
LB: loop body
LE: loop exit
PB: predicated region body
PF: predicated region fallthrough
CT: control target
= control target key end

     0   :  { %7 = vsyncpa [#allocation4], 0  ;;  %s613_s0 = inlined_call_operand.vmem [shape: f32[16,32], index: 0, kind: input, shape index: {}]   ;;  %s614_s1 = inlined_call_operand.vmem [shape: bf16[32,256], index: 1, kind: input, shape index: {}]   ;;  %s615_s2 = inlined_call_operand.hbm [shape: f32[16,256], index: 2, kind: output, shape index: {}]  }
   0x1   :  { %9 = vsyncpa [#allocation4 + $0x1], 0  ;;  %s500_s9 = smov 0   ;;  %s502_s10 = smov 0  }
   0x2   :  { %s504_s11 = smov 0   ;;  %s506_s12 = smov 0  }
   0x3 LB: > { %s344_s13 = sadd.s32 4294967295, %s477_s12   ;;  %s345_s14 = sadd.s32 4294967294, %s477_s12   ;;  %s477_s12 = sphi %s506_s12, %s621_s12   ;;  %s473_s11 = sphi %s504_s11, %s620_s11   ;;  %s469_s10 = sphi %s502_s10, %s619_s10   ;;  %s465_s9 = sphi %s500_s9, %s618_s9  }
   0x4   : > { %s523_s15 = sadd.s32 1, %s477_s12   ;;  %s43_s16 = sadd.s32 1, %s473_s11 }
   0x5   : > { %s40_s17 = ssub.s32 %s477_s12, %s523_s15  ;;  %p50_p0 = scmp.ne.s32.totalorder %s473_s11, %s469_s10 }
   0x6   : > { %p41_p1 = scmp.eq.s32.totalorder %s40_s17, 0  ;;  %p51_p2 = scmp.eq.s32.totalorder %s477_s12, 0 }
   0x7   : > { %p80_p3 = scmp.eq.s32.totalorder %s344_s13, 1  ;;  %p85_p4 = scmp.ne.s32.totalorder %s469_s10, %s465_s9 }
   0x8   : > { %s536_s18 = scalar_select %p41_p1, %s473_s11, %s43_s16  }
   0x9   : > { %p52_p5 = por %p51_p2, %p50_p0  ;;  %p538_p6 = por %p80_p3, %p50_p0 }
   0xa   : > { %p86_p7 = scmp.eq.s32.totalorder %s345_s14, 1  ;;  %p347_p9 = scmp.ge.s32.totalorder %s477_s12, 2 }
   0xc   : > { %p542_p8 = por %p86_p7, %p85_p4  ;;  %105 = sbr.rel (%p347_p9) target bundleno = 23 (0x17), region = 20 }
  0x11   : > { %108 = sbr.rel (!%p52_p5) target bundleno = 23 (0x17), region = 24  ;;  %s110_s21 = sand.u32 (%p52_p5), 1, %s473_s11  }
  0x12   : > { %s349_s22 = sshll.u32 (%p52_p5), %s477_s12, 2  ;;  %s348_s23 = sshll.u32 (%p52_p5), %s110_s21, 4 }
  0x13   : > { %s114_s26 = scalar_lea.vmem (%p52_p5), %s614_s1, %s349_s22  ;;  %s112_s27 = scalar_lea.vmem (%p52_p5), [#allocation2], %s348_s23 }
  0x14   : > { %v131_v0 = vld [vmem:[%s114_s26] sm:$0xf] (%p52_p5)  ;;  %v133_v1 = vld [vmem:[%s114_s26 + $0x8] sm:$0xf] (%p52_p5)  ;;  %v135_v2 = vld [vmem:[%s114_s26 + $0x10] sm:$0xf] (%p52_p5) }
  0x15   : > { %132 = vst [vmem:[%s112_s27] sm:$0xf] (%p52_p5), %v131_v0  ;;  %134 = vst [vmem:[%s112_s27 + $0x4] sm:$0xf] (%p52_p5), %v133_v1  ;;  %v137_v3 = vld [vmem:[%s114_s26 + $0x18] sm:$0xf] (%p52_p5) }
  0x16   : > { %136 = vst [vmem:[%s112_s27 + $0x8] sm:$0xf] %v135_v2  ;;  %138 = vst [vmem:[%s112_s27 + $0xc] sm:$0xf] %v137_v3 }
  0x17 PF: > { %p350_p10 = scmp.ge.s32.totalorder %s477_s12, 1  ;;  %p169_p11 = scmp.lt.s32.totalorder %s477_s12, 3 }
  0x19   : > { %p170_p12 = pnand %p350_p10, %p169_p11 }
  0x1a   : > { %s176_s28 = sand.u32 (!%p170_p12), 1, %s469_s10   ;;  %s357_s14 = sshll.u32 (!%p170_p12), %s344_s13, 7 }
  0x1b   : > { %173 = sbr.rel (%p170_p12) target bundleno = 254 (0xfe), region = 65  ;;  %s351_s29 = sshll.u32 (!%p170_p12), %s176_s28, 4 }
  0x1c   : > { %s178_s30 = scalar_lea.vmem (!%p170_p12), [#allocation2], %s351_s29  ;;  %s196_s7 = scalar_lea.vmem (!%p170_p12), [#allocation3], %s351_s29 }
  0x1d   : > { %s277_s8 = sshll.u32 (!%p170_p12), %s196_s7, 4  ;;  %s570_s21 = scalar_lea.hbm (!%p170_p12), %s615_s2, %s357_s14  ;;  %s565_s8 = int_to_ptr.vmem [resolvable:$true] %s277_s8 }
  0x1e   : > { %s572_s22 = scalar_lea.sflag (!%p170_p12), [#allocation4], %s176_s28  ;;  %s417_s23 = scalar_lea.vmem (!%p170_p12), %s565_s8, 256 }
  0x1f   : > { %p418_p13 = scmp.ne.s32.totalorder (!%p170_p12), %s565_s8, %s417_s23  ;;  %s481_s13 = smov (!%p170_p12), [#allocation3]  }
  0x20   : > { %v479_v4 = vmov 0.0   ;;  %vm480_vm0 = vmmov 0   ;;  %v415_v5 = vld [vmem:[%s178_s30 + $0x8] sm:$0xff]   ;;  %v416_v6 = vld [vmem:[%s178_s30] sm:$0xff]   ;;  %vm217_vm1 = vcmask 261120   ;;  %s421_s24 = sshll.u32 %s481_s13, 4  ;;  %s422_s24 = int_to_ptr.vmem [resolvable:$false] %s421_s24 }
  0x21   : > { %363 = vmatprep.subr.bf16.mxu0 %v479_v4  ;;  %367 = vmatprep.mubr.msk.bf16.mxu0 %vm480_vm0, %v479_v4  ;;  %v198_v7 = vld [vmem:[%s613_s0] sm:$0xff]  ;;  %v199_v8 = vld [vmem:[%s613_s0 + $0x8] sm:$0xff]  ;;  %p419_p0 = pnand %p418_p13, %p538_p6  ;;  %s423_s25 = scalar_lea.vmem %s422_s24, 512 }
  0x22   : > { %364 = vmatpush3.bf16.msra.mxu0 %v415_v5  ;;  %v200_v9 = vpack.c.bf16 %v199_v8, %v198_v7  ;;  %p424_p2 = scmp.lt.s32.totalorder %s565_s8, %s422_s24  ;;  %p425_p3 = scmp.lt.s32.totalorder %s423_s25, %s417_s23 }
  0x23   : > { %365 = vmatprep.subr.bf16.mxu0 %v479_v4  ;;  %p420_p1 = pneg %p419_p0 }
  0x24   : > { %p426_p4 = por %p425_p3, %p424_p2 }
  0x26   : > { %366 = vmatpush3.bf16.msra.mxu0 %v416_v6  ;;  %p427_p5 = pnand %p426_p4, %p420_p1 }
  0x29   : > { %368 = vmatmul.mubr.msk.bf16.vlgmr.msra.gmra.mxu0 %vm217_vm1, %v200_v9 }
  0xe9   : > { %v255_v10 = vpop.f32.mrf.mxu0 }
  0xea   : > { %262 = vst [vmem:[%s196_s7] sm:$0xff] %v255_v10 }
  0xeb   : > { %v369_v11 = vpop.f32.mrf.mxu0 }
  0xed   : > { %v258_v12 = vpop.f32.mrf.mxu0 }
  0xee   : > { %263 = vst [vmem:[%s196_s7 + $0x8] sm:$0xff] %v258_v12 }
  0xef   : > { %v370_v13 = vpop.f32.mrf.mxu0 }
  0xf0   : > { %430 = shalt.err (!%p427_p5)
}
  0xf1   : > { %s431_s26 = scalar_lea.hbm %s570_s21, 256  ;;  %s435_s29 = scalar_lea.hbm %s615_s2, 512 }
  0xf2   : > { %p432_p7 = scmp.ne.s32.totalorder %s570_s21, %s431_s26  ;;  %p436_p12 = scmp.lt.s32.totalorder %s570_s21, %s615_s2 }
  0xf3   : > { %p437_p13 = scmp.lt.s32.totalorder %s435_s29, %s431_s26 }
  0xf4   : > { %p433_p10 = pnand %p432_p7, %p538_p6 }
  0xf5   : > { %p438_p0 = por %p437_p13, %p436_p12 }
  0xf6   : > { %p434_p11 = pneg %p433_p10 }
  0xf8   : > { %p439_p1 = pnand %p438_p0, %p434_p11 }
  0xfa   : > { %442 = shalt.err (!%p439_p1)
}
  0xfb   : > { %s482_s4 = smov 128   ;;  %s483_s5 = smov 256  }
  0xfc   : > { %s484_s6 = smov 8  }
  0xfd   : > { %371 = dma.vmem_to_hbm [thread:$0]  (%p538_p6), %s565_s8, 256, %s570_s21, %s572_s22, %s482_s4, %s483_s5, %s484_s6  }
  0xfe PF: > { %s292_s7 = sand.u32 1, %s465_s9   ;;  %p374_p2 = pnand %p347_p9, %p542_p8 }
  0xff   : > { %s293_s14 = scalar_lea.sflag [#allocation4], %s292_s7 }
 0x100   : > { %p375_p3 = pneg %p374_p2 }
 0x102   : > { %460 = dma.done.wait (%p375_p3), %s293_s14, 256  }
 0x103   : > { %462 = vsyncadd (%p375_p3), %s293_s14, 4294967040  ;;  %p12_p4 = scmp.ge.s32.totalorder %s523_s15, 4   ;;  %s618_s9 = smov %s469_s10 }
 0x104   : > { %s619_s10 = smov %s473_s11  ;;  %s620_s11 = smov %s536_s18 }
 0x105   : > { %s621_s12 = smov %s523_s15  ;;  %14 = sbr.rel (!%p12_p4) target bundleno = 3 (0x3), region = 109 }
 0x10a   :  { %298 = vsyncpa [#allocation4], 1 }
 0x10b   :  { %300 = vsyncpa [#allocation4 + $0x1], 1 }

// kernel: t5_fine_tuner_forward.3
= control target key start
LH: loop header
LB: loop body
LE: loop exit
PB: predicated region body
PF: predicated region fallthrough
CT: control target
= control target key end

     0   :  { %s1577_s13 = smov 0   ;;  %s1755_s0 = inlined_call_operand.vmem [shape: f32[2,8,32], index: 0, kind: input, shape index: {}]   ;;  %s1756_s1 = inlined_call_operand.vmem [shape: f32[2,1,8], index: 1, kind: input, shape index: {}]   ;;  %s1757_s2 = inlined_call_operand.vmem [shape: f32[1,32], index: 2, kind: input, shape index: {}]   ;;  %s1758_s3 = inlined_call_operand.vmem [shape: bf16[32,96], index: 3, kind: input, shape index: {}]   ;;  %s1759_s4 = inlined_call_operand.vmem [shape: bf16[32,32], index: 4, kind: input, shape index: {}]   ;;  %s1760_s5 = inlined_call_operand.vmem [shape: f32[1,32], index: 5, kind: input, shape index: {}]   ;;  %s1761_s6 = inlined_call_operand.vmem [shape: bf16[32,64], index: 6, kind: input, shape index: {}]   ;;  %s1762_s7 = inlined_call_operand.vmem [shape: bf16[32,64], index: 7, kind: input, shape index: {}]   ;;  %s1763_s8 = inlined_call_operand.vmem [shape: bf16[64,32], index: 8, kind: input, shape index: {}]   ;;  %s1764_s9 = inlined_call_operand.vmem [shape: f32[1,32], index: 9, kind: input, shape index: {}]   ;;  %s1765_s10 = inlined_call_operand.vmem [shape: f32[2,8,32], index: 10, kind: output, shape index: {}]  }
   0x1 LB: > { %s1275_s14 = sadd.s32 4294967295, %s1504_s13   ;;  %p1279_p0 = scmp.ge.s32.totalorder %s1504_s13, 1  ;;  %s1504_s13 = sphi %s1577_s13, %s20_s13  }
   0x2   : > { %p319_p1 = scmp.lt.s32.totalorder %s1504_s13, 3 }
   0x4   : > { %p320_p2 = pnand %p1279_p0, %p319_p1 }
   0x5   : > { %p358_p3 = scmp.lt.s32.totalorder (!%p320_p2), %s1275_s14, 1  ;;  %s1508_s25 = smov (!%p320_p2), 88  }
   0x6   : > { %323 = sbr.rel (%p320_p2) target bundleno = 2325 (0x915), region = 60  ;;  %s1509_s26 = smov (!%p320_p2), 96  }
   0x7   : > { %s1510_s27 = smov (!%p320_p2), 120   ;;  %s1511_s28 = smov (!%p320_p2), 80  }
   0x8   : > { %s1512_s29 = smov (!%p320_p2), 112   ;;  %s1513_s30 = smov (!%p320_p2), 72  }
   0x9   : > { %s1514_s11 = smov (!%p320_p2), 104   ;;  %s1516_s19 = smov (!%p320_p2), 64  }
   0xa   : > { %s1517_s20 = smov (!%p320_p2), 40   ;;  %s1518_s21 = smov (!%p320_p2), 48  }
   0xb   : > { %s1767_s14 = smov (!%p358_p3, %s1275_s14), 1  ;;  %vm374_vm0 = vcmask 261120   ;;  %v1462_v3 = vld [vmem:[%s1758_s3 + $0x8] sm:$0xff]   ;;  %v1506_v4 = vmov 0.0   ;;  %vm1507_vm1 = vmmov 0   ;;  %v1463_v5 = vld [vmem:[%s1758_s3] sm:$0xff]  }
   0xc   : > { %s1280_s15 = sshll.u32 %s1767_s14, 3  ;;  %1346 = vmatprep.subr.bf16.mxu1 %v1506_v4  ;;  %1350 = vmatprep.mubr.msk.bf16.mxu1 %vm1507_vm1, %v1506_v4  ;;  %v1282_v10 = vld [vmem:[%s1757_s2] ss:$0 sm:$0xff]  ;;  %vm464_vm2 = vcmask 64512   ;;  %s364_s17 = scalar_lea.vmem %s1756_s1, %s1767_s14  ;;  %vm528_vm3 = vcmask 1043456   ;;  %vm915_vm4 = vcmask 130048  }
   0xd   : > { %s361_s18 = scalar_lea.vmem %s1755_s0, %s1280_s15  ;;  %1347 = vmatpush3.bf16.msra.mxu1 %v1462_v3  ;;  %1360 = vmatprep.subr.bf16.mxu0 %v1506_v4  ;;  %v1286_v30 = vld [vmem:[%s364_s17] ss:$0 sm:$0xff]  ;;  %s1519_s22 = smov 8   ;;  %vm917_vm5 = vcmask 195584   ;;  %vm1151_vm6 = vcmask 523264  }
   0xe   : > { %v1593_v0 = vld [vmem:[%s361_s18] sm:$0xff]  ;;  %1348 = vmatprep.subr.bf16.mxu1 %v1506_v4  ;;  %1362 = vmatprep.mubr.msk.bf16.mxu0 %vm1507_vm1, %v1506_v4  ;;  %s1515_s18 = smov 56   ;;  %s368_s17 = scalar_lea.vmem %s1765_s10, %s1280_s15 }
   0xf   : > { %v373_v1 = vmul.f32 %v1593_v0, %v1593_v0 }
  0x11   : > { %v375_v2 = vsel %vm374_vm0, %v373_v1, 0.0  ;;  %1349 = vmatpush3.bf16.msra.mxu1 %v1463_v5 }
  0x12   : > { %376 = vadd.xlane.f32.xlu0 %v375_v2  ;;  %1354 = vmatprep.subr.bf16.mxu1 %v1506_v4 }
  0x9b   : > { %v377_v6 = vpop.xlane.xlu0 %376 }
  0x9c   : > { %v379_v7 = vmul.f32 0.03125, %v377_v6 }
  0x9e   : > { %v380_v8 = vadd.f32 1e-06, %v379_v7 }
  0xa0   : > { %1474 = vrsqrt.f32 %v380_v8 }
  0xad   : > { %v1475_v9 = vpop.eup %1474 }
  0xae   : > { %v382_v11 = vmul.f32 %v1475_v9, %v1593_v0 }
  0xb0   : > { %v389_v12 = vmul.f32 %v1282_v10, %v382_v11 }
  0xb2   : > { %v390_v13 = vpack.c.bf16 %v389_v12, %v389_v12 }
  0xb4   : > { %1351 = vmatmul.mubr.msk.bf16.vlgmr.msra.gmra.mxu1 %vm374_vm0, %v390_v13 }
  0xb5   : > { %1356 = vmatprep.mubr.msk.bf16.mxu1 %vm1507_vm1, %v1506_v4 }
 0x174   : > { %v444_v14 = vpop.f32.mrf.mxu1 }
 0x175   : > { %v1619_v15 = vpack.c.bf16 %v444_v14, %v444_v14 }
 0x176   : > { %v1352_v16 = vpop.f32.mrf.mxu1 }
 0x177   : > { %574 = vrot.lane.b32.xlu1 %v1619_v15, %s1508_s25  ;;  %462 = vrot.lane.b32.xlu0 %v1619_v15, %s1509_s26 }
 0x178   : > { %v447_v17 = vpop.f32.mrf.mxu1 }
 0x17a   : > { %v1353_v18 = vpop.f32.mrf.mxu1 }
 0x17b   : > { %572 = vrot.lane.b32.xlu1 %v1619_v15, %s1510_s27  ;;  %s1520_s27 = smov 16  }
 0x17f   : > { %684 = vrot.lane.b32.xlu1 %v1619_v15, %s1511_s28  ;;  %s1521_s28 = smov 24  }
 0x183   : > { %682 = vrot.lane.b32.xlu1 %v1619_v15, %s1512_s29 }
 0x187   : > { %794 = vrot.lane.b32.xlu1 %v1619_v15, %s1513_s30 }
 0x18b   : > { %792 = vrot.lane.b32.xlu1 %v1619_v15, %s1514_s11 }
 0x1e9   : > { %v575_v19 = vpop.permute.xlu1 %574  ;;  %v463_v20 = vpop.permute.xlu0 %462 }
 0x1ea   : > { %v469_v21 = vsel %vm464_vm2, %v463_v20, 0  ;;  %v580_v23 = vsel %vm464_vm2, %v575_v19, 0 }
 0x1eb   : > { %1355 = vmatpush3.bf16.xpose.msra.mxu1 %v469_v21 }
 0x1ec   : > { %1366 = vmatprep.subr.bf16.mxu1 %v1506_v4 }
 0x1ed   : > { %v573_v22 = vpop.permute.xlu1 %572 }
 0x1f1   : > { %v685_v24 = vpop.permute.xlu1 %684 }
 0x1f2   : > { %1357 = vmatmul.mubr.msk.bf16.vlgmr.msra.gmra.mxu1 %vm464_vm2, %v1619_v15  ;;  %v690_v26 = vsel %vm464_vm2, %v685_v24, 0 }
 0x1f3   : > { %1367 = vmatpush3.bf16.xpose.msra.mxu1 %v580_v23  ;;  %1368 = vmatprep.mubr.msk.bf16.mxu1 %vm1507_vm1, %v1506_v4 }
 0x1f4   : > { %1378 = vmatprep.subr.bf16.mxu1 %v1506_v4 }
 0x1f5   : > { %v683_v25 = vpop.permute.xlu1 %682 }
 0x1f9   : > { %v795_v27 = vpop.permute.xlu1 %794 }
 0x1fa   : > { %1369 = vmatmul.mubr.msk.bf16.vlgmr.msra.gmra.mxu1 %vm464_vm2, %v573_v22  ;;  %v800_v28 = vsel %vm464_vm2, %v795_v27, 0 }
 0x1fb   : > { %1379 = vmatpush3.bf16.xpose.msra.mxu1 %v690_v26  ;;  %1380 = vmatprep.mubr.msk.bf16.mxu1 %vm1507_vm1, %v1506_v4 }
 0x1fc   : > { %1390 = vmatprep.subr.bf16.mxu1 %v1506_v4 }
 0x1fd   : > { %v793_v29 = vpop.permute.xlu1 %792 }
 0x202   : > { %1381 = vmatmul.mubr.msk.bf16.vlgmr.msra.gmra.mxu1 %vm464_vm2, %v683_v25 }
 0x203   : > { %1391 = vmatpush3.bf16.xpose.msra.mxu1 %v800_v28  ;;  %1392 = vmatprep.mubr.msk.bf16.mxu1 %vm1507_vm1, %v1506_v4 }
 0x204   : > { %1402 = vmatprep.subr.bf16.mxu1 %v1506_v4 }
 0x20a   : > { %1393 = vmatmul.mubr.msk.bf16.vlgmr.msra.gmra.mxu1 %vm464_vm2, %v793_v29 }
 0x20b   : > { %1406 = vmatprep.mubr.msk.bf16.mxu1 %vm1507_vm1, %v1506_v4 }
 0x2b2   : > { %v505_v31 = vpop.f32.mrf.mxu1 }
 0x2b3   : > { %v506_v32 = vadd.f32 %v1286_v30, %v505_v31 }
 0x2b4   : > { %v1358_v33 = vpop.f32.mrf.mxu1 }
 0x2b5   : > { %v511_v34 = vsel %vm464_vm2, %v506_v32, -inf }
 0x2b6   : > { %512 = vmax.xlane.f32.xlu1 %v511_v34  ;;  %v508_v35 = vpop.f32.mrf.mxu1 }
 0x2b8   : > { %v1359_v36 = vpop.f32.mrf.mxu1 }
 0x2ba   : > { %v616_v37 = vpop.f32.mrf.mxu1 }
 0x2bb   : > { %v617_v38 = vadd.f32 %v1286_v30, %v616_v37 }
 0x2bc   : > { %v1370_v39 = vpop.f32.mrf.mxu1 }
 0x2bd   : > { %v622_v40 = vsel %vm464_vm2, %v617_v38, -inf }
 0x2be   : > { %623 = vmax.xlane.f32.xlu0 %v622_v40  ;;  %v619_v41 = vpop.f32.mrf.mxu1 }
 0x2c0   : > { %v1371_v42 = vpop.f32.mrf.mxu1 }
 0x2c2   : > { %v726_v43 = vpop.f32.mrf.mxu1 }
 0x2c3   : > { %v727_v44 = vadd.f32 %v1286_v30, %v726_v43 }
 0x2c4   : > { %v1382_v45 = vpop.f32.mrf.mxu1 }
 0x2c5   : > { %v732_v46 = vsel %vm464_vm2, %v727_v44, -inf  ;;  %v1464_v45 = vld [vmem:[%s1759_s4 + $0x8] sm:$0xff]  }
 0x2c6   : > { %733 = vmax.xlane.f32.xlu0 %v732_v46  ;;  %v729_v47 = vpop.f32.mrf.mxu1  ;;  %1403 = vmatpush3.bf16.msra.mxu1 %v1464_v45  ;;  %v1465_v46 = vld [vmem:[%s1759_s4] sm:$0xff]  }
 0x2c7   : > { %1404 = vmatprep.subr.bf16.mxu1 %v1506_v4 }
 0x2c8   : > { %v1383_v48 = vpop.f32.mrf.mxu1 }
 0x2ca   : > { %v836_v49 = vpop.f32.mrf.mxu1  ;;  %1405 = vmatpush3.bf16.msra.mxu1 %v1465_v46 }
 0x2cb   : > { %v837_v50 = vadd.f32 %v1286_v30, %v836_v49  ;;  %1418 = vmatprep.subr.bf16.mxu1 %v1506_v4 }
 0x2cc   : > { %v1394_v51 = vpop.f32.mrf.mxu1 }
 0x2cd   : > { %v842_v52 = vsel %vm464_vm2, %v837_v50, -inf }
 0x2ce   : > { %843 = vmax.xlane.f32.xlu1 %v842_v52  ;;  %v839_v53 = vpop.f32.mrf.mxu1 }
 0x2d0   : > { %v1395_v54 = vpop.f32.mrf.mxu1 }
 0x33f   : > { %v513_v55 = vpop.xlane.xlu1 %512 }
 0x340   : > { %v514_v56 = vsub.f32 %v506_v32, %v513_v55 }
 0x342   : > { %v515_v57 = vmul.f32 1.442695, %v514_v56 }
 0x344   : > { %1476 = vpow2.f32 %v515_v57 }
 0x347   : > { %v624_v58 = vpop.xlane.xlu0 %623 }
 0x348   : > { %v625_v59 = vsub.f32 %v617_v38, %v624_v58 }
 0x34a   : > { %v626_v60 = vmul.f32 1.442695, %v625_v59 }
 0x34c   : > { %1478 = vpow2.f32 %v626_v60 }
 0x34f   : > { %v734_v61 = vpop.xlane.xlu0 %733 }
 0x350   : > { %v735_v62 = vsub.f32 %v727_v44, %v734_v61 }
 0x351   : > { %v1477_v63 = vpop.eup %1476 }
 0x352   : > { %v736_v1 = vmul.f32 1.442695, %v735_v62  ;;  %v517_v2 = vsel %vm464_vm2, %v1477_v63, 0.0 }
 0x353   : > { %518 = vadd.xlane.f32.xlu0 %v517_v2 }
 0x354   : > { %1480 = vpow2.f32 %v736_v1 }
 0x357   : > { %v844_v8 = vpop.xlane.xlu1 %843 }
 0x358   : > { %v845_v9 = vsub.f32 %v837_v50, %v844_v8  ;;  %v1467_v8 = vld [vmem:[%s1762_s7 + $0x8] sm:$0xff]  }
 0x359   : > { %v1479_v3 = vpop.eup %1478 }
 0x35a   : > { %v628_v5 = vsel %vm464_vm2, %v1479_v3, 0.0  ;;  %v846_v10 = vmul.f32 1.442695, %v845_v9  ;;  %v1469_v9 = vld [vmem:[%s1762_s7] sm:$0xff]  }
 0x35b   : > { %629 = vadd.xlane.f32.xlu1 %v628_v5 }
 0x35c   : > { %1482 = vpow2.f32 %v846_v10 }
 0x361   : > { %v1481_v6 = vpop.eup %1480 }
 0x362   : > { %v738_v7 = vsel %vm464_vm2, %v1481_v6, 0.0 }
 0x363   : > { %739 = vadd.xlane.f32.xlu0 %v738_v7  ;;  %v1466_v7 = vld [vmem:[%s1761_s6 + $0x8] sm:$0xff]  }
 0x369   : > { %v1483_v11 = vpop.eup %1482 }
 0x36a   : > { %v848_v12 = vsel %vm464_vm2, %v1483_v11, 0.0 }
 0x36c   : > { %634 = vrot.lane.b32.xlu1 %v1619_v15, %s1515_s18 }
 0x379   : > { %523 = vrot.lane.b32.xlu0 %v1619_v15, %s1516_s19 }
 0x37d   : > { %854 = vrot.lane.b32.xlu0 %v1619_v15, %s1517_s20 }
 0x390   : > { %849 = vadd.xlane.f32.xlu1 %v848_v12 }
 0x3a1   : > { %744 = vrot.lane.b32.xlu1 %v1619_v15, %s1518_s21 }
 0x3dc   : > { %v519_v13 = vpop.xlane.xlu0 %518 }
 0x3dd   : > { %1484 = vrcp.f32 %v519_v13 }
 0x3e4   : > { %v630_v14 = vpop.xlane.xlu1 %629 }
 0x3e5   : > { %1486 = vrcp.f32 %v630_v14  ;;  %v1298_v14 = vld [vmem:[%s1760_s5] ss:$0 sm:$0xff] }
 0x3e8   : > { %v635_v21 = vpop.permute.xlu1 %634 }
 0x3e9   : > { %v640_v24 = vsel %vm528_vm3, %v635_v21, 0  ;;  %v1472_v21 = vld [vmem:[%s1763_s8 + $0x8] sm:$0xff]  }
 0x3ea   : > { %v1485_v16 = vpop.eup %1484 }
 0x3eb   : > { %v521_v18 = vmul.f32 %v1485_v16, %v1477_v63 }
 0x3ec   : > { %v740_v17 = vpop.xlane.xlu0 %739 }
 0x3ed   : > { %v522_v22 = vpack.c.bf16 %v521_v18, %v521_v18  ;;  %1488 = vrcp.f32 %v740_v17 }
 0x3f0   : > { %v524_v19 = vpop.permute.xlu0 %523 }
 0x3f1   : > { %v530_v20 = vsel %vm528_vm3, %v524_v19, 0  ;;  %v1470_v19 = vld [vmem:[%s1763_s8 + $0x18] sm:$0xff]  }
 0x3f2   : > { %1361 = vmatpush3.bf16.msra.mxu0 %v530_v20  ;;  %v1487_v23 = vpop.eup %1486  ;;  %v1471_v20 = vld [vmem:[%s1763_s8 + $0x10] sm:$0xff]  }
 0x3f3   : > { %1372 = vmatprep.subr.bf16.mxu0 %v1506_v4  ;;  %v632_v15 = vmul.f32 %v1487_v23, %v1479_v3 }
 0x3f4   : > { %v855_v31 = vpop.permute.xlu0 %854 }
 0x3f5   : > { %1363 = vmatmul.mubr.msk.bf16.vlgmr.msra.gmra.mxu0 %vm464_vm2, %v522_v22  ;;  %v633_v25 = vpack.c.bf16 %v632_v15, %v632_v15  ;;  %v860_v33 = vsel %vm528_vm3, %v855_v31, 0  ;;  %v1473_v22 = vld [vmem:[%s1763_s8] sm:$0xff]  }
 0x3f6   : > { %1373 = vmatpush3.bf16.msra.mxu0 %v640_v24  ;;  %1374 = vmatprep.mubr.msk.bf16.mxu0 %vm1507_vm1, %v1506_v4 }
 0x3f7   : > { %1384 = vmatprep.subr.bf16.mxu0 %v1506_v4 }
 0x3fa   : > { %v1489_v26 = vpop.eup %1488 }
 0x3fb   : > { %v742_v28 = vmul.f32 %v1489_v26, %v1481_v6 }
 0x3fd   : > { %1375 = vmatmul.mubr.msk.bf16.vlgmr.msra.gmra.mxu0 %vm464_vm2, %v633_v25  ;;  %v743_v32 = vpack.c.bf16 %v742_v28, %v742_v28 }
 0x3fe   : > { %1386 = vmatprep.mubr.msk.bf16.mxu0 %vm1507_vm1, %v1506_v4 }
 0x419   : > { %v850_v27 = vpop.xlane.xlu1 %849 }
 0x41a   : > { %1490 = vrcp.f32 %v850_v27 }
 0x41d   : > { %v745_v29 = vpop.permute.xlu1 %744 }
 0x41e   : > { %v750_v30 = vsel %vm528_vm3, %v745_v29, 0 }
 0x41f   : > { %1385 = vmatpush3.bf16.msra.mxu0 %v750_v30 }
 0x420   : > { %1396 = vmatprep.subr.bf16.mxu0 %v1506_v4 }
 0x422   : > { %1387 = vmatmul.mubr.msk.bf16.vlgmr.msra.gmra.mxu0 %vm464_vm2, %v743_v32 }
 0x423   : > { %1397 = vmatpush3.bf16.msra.mxu0 %v860_v33  ;;  %1398 = vmatprep.mubr.msk.bf16.mxu0 %vm1507_vm1, %v1506_v4 }
 0x424   : > { %1410 = vmatprep.subr.bf16.mxu0 %v1506_v4 }
 0x427   : > { %v1491_v34 = vpop.eup %1490 }
 0x428   : > { %v852_v35 = vmul.f32 %v1491_v34, %v1483_v11 }
 0x42a   : > { %v853_v36 = vpack.c.bf16 %v852_v35, %v852_v35 }
 0x42c   : > { %1399 = vmatmul.mubr.msk.bf16.vlgmr.msra.gmra.mxu0 %vm464_vm2, %v853_v36 }
 0x42d   : > { %1414 = vmatprep.mubr.msk.bf16.mxu0 %vm1507_vm1, %v1506_v4  ;;  %1411 = vmatpush3.bf16.msra.mxu0 %v1466_v7 }
 0x42e   : > { %1412 = vmatprep.subr.bf16.mxu0 %v1506_v4 }
 0x4b5   : > { %v566_v37 = vpop.f32.mrf.mxu0 }
 0x4b7   : > { %v1364_v38 = vpop.f32.mrf.mxu0 }
 0x4b9   : > { %v569_v39 = vpop.f32.mrf.mxu0 }
 0x4bb   : > { %v1365_v40 = vpop.f32.mrf.mxu0 }
 0x4bd   : > { %v676_v41 = vpop.f32.mrf.mxu0 }
 0x4be   : > { %903 = vrot.lane.b32.xlu1 %v676_v41, %s1519_s22 }
 0x4bf   : > { %v1376_v42 = vpop.f32.mrf.mxu0 }
 0x4c1   : > { %v679_v43 = vpop.f32.mrf.mxu0 }
 0x4c3   : > { %v1377_v44 = vpop.f32.mrf.mxu0 }
 0x4e2   : > { %v786_v47 = vpop.f32.mrf.mxu0 }
 0x4e3   : > { %907 = vrot.lane.b32.xlu0 %v786_v47, %s1520_s27 }
 0x4e4   : > { %v1388_v48 = vpop.f32.mrf.mxu0 }
 0x4e6   : > { %v789_v49 = vpop.f32.mrf.mxu0 }
 0x4e8   : > { %v1389_v50 = vpop.f32.mrf.mxu0 }
 0x4ec   : > { %v896_v51 = vpop.f32.mrf.mxu0 }
 0x4ed   : > { %911 = vrot.lane.b32.xlu1 %v896_v51, %s1521_s28  ;;  %v1310_v51 = vld [vmem:[%s1764_s9] ss:$0 sm:$0xff] }
 0x4ee   : > { %v1400_v52 = vpop.f32.mrf.mxu0 }
 0x4f0   : > { %v899_v53 = vpop.f32.mrf.mxu0 }
 0x4f2   : > { %v1401_v54 = vpop.f32.mrf.mxu0 }
 0x530   : > { %v904_v55 = vpop.permute.xlu1 %903 }
 0x531   : > { %v914_v57 = vsel %vm464_vm2, %v566_v37, %v904_v55 }
 0x555   : > { %v908_v56 = vpop.permute.xlu0 %907 }
 0x556   : > { %v916_v58 = vsel %vm915_vm4, %v914_v57, %v908_v56 }
 0x55f   : > { %v912_v59 = vpop.permute.xlu1 %911 }
 0x560   : > { %v918_v60 = vsel %vm917_vm5, %v916_v58, %v912_v59 }
 0x561   : > { %v919_v61 = vpack.c.bf16 %v918_v60, %v918_v60 }
 0x563   : > { %1407 = vmatmul.mubr.msk.bf16.vlgmr.msra.gmra.mxu1 %vm374_vm0, %v919_v61 }
 0x564   : > { %1422 = vmatprep.mubr.msk.bf16.mxu1 %vm1507_vm1, %v1506_v4  ;;  %1419 = vmatpush3.bf16.msra.mxu1 %v1467_v8 }
 0x565   : > { %1420 = vmatprep.subr.bf16.mxu1 %v1506_v4 }
 0x568   : > { %1421 = vmatpush3.bf16.msra.mxu1 %v1469_v9 }
 0x623   : > { %v969_v62 = vpop.f32.mrf.mxu1 }
 0x624   : > { %v1698_v63 = vadd.f32 %v969_v62, %v1593_v0  ;;  %v1468_v0 = vld [vmem:[%s1761_s6] sm:$0xff]  }
 0x625   : > { %v1408_v1 = vpop.f32.mrf.mxu1  ;;  %1413 = vmatpush3.bf16.msra.mxu0 %v1468_v0 }
 0x626   : > { %v993_v2 = vmul.f32 %v1698_v63, %v1698_v63  ;;  %1426 = vmatprep.subr.bf16.mxu0 %v1506_v4 }
 0x627   : > { %v972_v3 = vpop.f32.mrf.mxu1 }
 0x628   : > { %v994_v5 = vsel %vm374_vm0, %v993_v2, 0.0 }
 0x629   : > { %995 = vadd.xlane.f32.xlu0 %v994_v5  ;;  %v1409_v6 = vpop.f32.mrf.mxu1 }
 0x6b2   : > { %v996_v10 = vpop.xlane.xlu0 %995 }
 0x6b3   : > { %v997_v11 = vmul.f32 0.03125, %v996_v10 }
 0x6b5   : > { %v998_v12 = vadd.f32 1e-06, %v997_v11 }
 0x6b7   : > { %1492 = vrsqrt.f32 %v998_v12 }
 0x6c4   : > { %v1493_v13 = vpop.eup %1492 }
 0x6c5   : > { %v1000_v16 = vmul.f32 %v1493_v13, %v1698_v63 }
 0x6c7   : > { %v1007_v17 = vmul.f32 %v1298_v14, %v1000_v16 }
 0x6c9   : > { %v1008_v18 = vpack.c.bf16 %v1007_v17, %v1007_v17 }
 0x6cb   : > { %1415 = vmatmul.mubr.msk.bf16.vlgmr.msra.gmra.mxu0 %vm374_vm0, %v1008_v18  ;;  %1423 = vmatmul.mubr.msk.bf16.vlgmr.msra.gmra.mxu1 %vm374_vm0, %v1008_v18 }
 0x6cc   : > { %1434 = vmatprep.mubr.msk.bf16.mxu0 %vm1507_vm1, %v1506_v4  ;;  %1427 = vmatpush3.bf16.msra.mxu0 %v1470_v19 }
 0x6cd   : > { %1428 = vmatprep.subr.bf16.mxu0 %v1506_v4 }
 0x6d0   : > { %1429 = vmatpush3.bf16.msra.mxu0 %v1471_v20 }
 0x6d1   : > { %1430 = vmatprep.subr.bf16.mxu0 %v1506_v4 }
 0x6d4   : > { %1431 = vmatpush3.bf16.msra.mxu0 %v1472_v21 }
 0x6d5   : > { %1432 = vmatprep.subr.bf16.mxu0 %v1506_v4 }
 0x6d8   : > { %1433 = vmatpush3.bf16.msra.mxu0 %v1473_v22 }
 0x78b   : > { %v1058_v23 = vpop.f32.mrf.mxu0  ;;  %v1119_v24 = vpop.f32.mrf.mxu1 }
 0x78c   : > { %v1064_v15 = vmul.f32 %v1058_v23, %v1058_v23 }
 0x78d   : > { %v1416_v25 = vpop.f32.mrf.mxu0  ;;  %v1424_v26 = vpop.f32.mrf.mxu1 }
 0x78e   : > { %v1065_v27 = vmul.f32 %v1064_v15, %v1058_v23 }
 0x78f   : > { %v1061_v28 = vpop.f32.mrf.mxu0  ;;  %v1122_v29 = vpop.f32.mrf.mxu1 }
 0x790   : > { %v1066_v30 = vmul.f32 0.044715, %v1065_v27 }
 0x791   : > { %v1417_v31 = vpop.f32.mrf.mxu0  ;;  %v1425_v32 = vpop.f32.mrf.mxu1 }
 0x792   : > { %v1067_v33 = vadd.f32 %v1066_v30, %v1058_v23 }
 0x794   : > { %v1068_v34 = vmul.f32 0.7978846, %v1067_v33 }
 0x796   : > { %1494 = vtanh.f32 %v1068_v34 }
 0x7a3   : > { %v1495_v4 = vpop.eup %1494 }
 0x7a4   : > { %v1070_v35 = vadd.f32 1.0, %v1495_v4 }
 0x7a6   : > { %v1071_v36 = vmul.f32 0.5, %v1070_v35 }
 0x7a8   : > { %v1072_v37 = vmul.f32 %v1071_v36, %v1058_v23 }
 0x7aa   : > { %v1125_v38 = vmul.f32 %v1119_v24, %v1072_v37 }
 0x7ac   : > { %v1126_v39 = vpack.c.bf16 %v1125_v38, %v1125_v38 }
 0x7ae   : > { %1435 = vmatmul.mubr.msk.bf16.vlgmr.msra.gmra.mxu0 %vm1151_vm6, %v1126_v39 }
 0x86e   : > { %v1189_v40 = vpop.f32.mrf.mxu0 }
 0x86f   : > { %v1195_v41 = vadd.f32 %v1189_v40, %v1698_v63 }
 0x870   : > { %v1436_v42 = vpop.f32.mrf.mxu0 }
 0x871   : > { %v1197_v43 = vmul.f32 %v1195_v41, %v1195_v41 }
 0x872   : > { %v1192_v44 = vpop.f32.mrf.mxu0 }
 0x873   : > { %v1198_v45 = vsel %vm374_vm0, %v1197_v43, 0.0 }
 0x874   : > { %1199 = vadd.xlane.f32.xlu1 %v1198_v45  ;;  %v1437_v46 = vpop.f32.mrf.mxu0 }
 0x8fd   : > { %v1200_v47 = vpop.xlane.xlu1 %1199 }
 0x8fe   : > { %v1201_v48 = vmul.f32 0.03125, %v1200_v47 }
 0x900   : > { %v1202_v49 = vadd.f32 1e-06, %v1201_v48 }
 0x902   : > { %1496 = vrsqrt.f32 %v1202_v49 }
 0x90f   : > { %v1497_v50 = vpop.eup %1496 }
 0x910   : > { %v1204_v52 = vmul.f32 %v1497_v50, %v1195_v41 }
 0x912   : > { %v1211_v53 = vmul.f32 %v1310_v51, %v1204_v52 }
 0x914   : > { %1212 = vst.msk [vmem:[%s368_s17] sm:$0xff] %vm374_vm0, %v1211_v53 }
 0x915 PF: > { %s20_s13 = sadd.s32 1, %s1504_s13  }
 0x916   : > { %p17_p4 = scmp.ge.s32.totalorder %s20_s13, 4  }
 0x918   :  { %19 = sbr.rel (!%p17_p4) target bundleno = 1 (0x1), region = 93 }

// kernel: t5_fine_tuner_forward.4
= control target key start
LH: loop header
LB: loop body
LE: loop exit
PB: predicated region body
PF: predicated region fallthrough
CT: control target
= control target key end

     0   :  { %s2631_s21 = smov 0   ;;  %s2946_s0 = inlined_call_operand.vmem [shape: f32[2,8,32], index: 0, kind: input, shape index: {}]   ;;  %s2947_s1 = inlined_call_operand.vmem [shape: f32[2,8,32], index: 1, kind: input, shape index: {}]   ;;  %s2948_s2 = inlined_call_operand.vmem [shape: f32[2,1,8], index: 2, kind: input, shape index: {}]   ;;  %s2949_s3 = inlined_call_operand.vmem [shape: f32[2,1,8], index: 3, kind: input, shape index: {}]   ;;  %s2950_s4 = inlined_call_operand.vmem [shape: f32[1,32], index: 4, kind: input, shape index: {}]   ;;  %s2951_s5 = inlined_call_operand.vmem [shape: bf16[32,96], index: 5, kind: input, shape index: {}]   ;;  %s2952_s6 = inlined_call_operand.vmem [shape: bf16[32,32], index: 6, kind: input, shape index: {}]   ;;  %s2953_s7 = inlined_call_operand.vmem [shape: f32[1,32], index: 7, kind: input, shape index: {}]   ;;  %s2954_s8 = inlined_call_operand.vmem [shape: bf16[32,32], index: 8, kind: input, shape index: {}]   ;;  %s2955_s9 = inlined_call_operand.vmem [shape: bf16[32,64], index: 9, kind: input, shape index: {}]   ;;  %s2956_s10 = inlined_call_operand.vmem [shape: bf16[32,32], index: 10, kind: input, shape index: {}]   ;;  %s2957_s11 = inlined_call_operand.vmem [shape: f32[1,32], index: 11, kind: input, shape index: {}]   ;;  %s2958_s12 = inlined_call_operand.vmem [shape: bf16[32,64], index: 12, kind: input, shape index: {}]   ;;  %s2959_s13 = inlined_call_operand.vmem [shape: bf16[32,64], index: 13, kind: input, shape index: {}]   ;;  %s2960_s14 = inlined_call_operand.vmem [shape: bf16[64,32], index: 14, kind: input, shape index: {}]   ;;  %s2961_s15 = inlined_call_operand.vmem [shape: f32[1,32], index: 15, kind: input, shape index: {}]   ;;  %s2962_s16 = inlined_call_operand.vmem [shape: f32[2,8,32], index: 16, kind: output, shape index: {}]  }
   0x1   :  { %2970 = sst [smem:[#allocation2_spill]] %s2946_s0 }
   0x2 LB: > { %s2156_s22 = sadd.s32 4294967295, %s2527_s21   ;;  %p2160_p0 = scmp.ge.s32.totalorder %s2527_s21, 1  ;;  %s2527_s21 = sphi %s2631_s21, %s26_s21  }
   0x3   : > { %p486_p1 = scmp.lt.s32.totalorder %s2527_s21, 3 }
   0x5   : > { %p487_p2 = pnand %p2160_p0, %p486_p1 }
   0x6   : > { %p544_p3 = scmp.lt.s32.totalorder (!%p487_p2), %s2156_s22, 1  ;;  %s2971_s26 = sld [smem:[#allocation2_spill]] (!%p487_p2) }
   0x7   : > { %490 = sbr.rel (%p487_p2) target bundleno = 3877 (0xf25), region = 84  ;;  %s2969_s19 = smov (!%p487_p2), 88  }
   0x8   : > { %s2967_s20 = smov (!%p487_p2), 96   ;;  %s2533_s24 = smov (!%p487_p2), 120  }
   0x9   : > { %s2968_s25 = smov (!%p487_p2), 80   ;;  %s2537_s28 = smov (!%p487_p2), 104  }
   0xa   : > { %s2539_s17 = smov (!%p487_p2), 56   ;;  %s2540_s18 = smov (!%p487_p2), 64  }
   0xb   : > { %s2541_s29 = smov (!%p487_p2), 40   ;;  %s2542_s30 = smov (!%p487_p2), 48  }
   0xc   : > { %s2980_s22 = smov (!%p544_p3, %s2156_s22), 1  ;;  %vm581_vm0 = vcmask 261120   ;;  %v2461_v3 = vld [vmem:[%s2951_s5 + $0x8] sm:$0xff]   ;;  %v2529_v4 = vmov 0.0   ;;  %vm2530_vm1 = vmmov 0   ;;  %v2462_v5 = vld [vmem:[%s2951_s5] sm:$0xff]   ;;  %v565_v30 = vlaneseq }
   0xd   : > { %s2642_s23 = sshll.u32 %s2980_s22, 3  ;;  %2272 = vmatprep.subr.bf16.mxu0 %v2529_v4  ;;  %2276 = vmatprep.mubr.msk.bf16.mxu0 %vm2530_vm1, %v2529_v4  ;;  %v2165_v10 = vld [vmem:[%s2950_s4] ss:$0 sm:$0xff]  ;;  %vm665_vm2 = vcmask 64512   ;;  %s554_s0 = scalar_lea.vmem %s2948_s2, %s2980_s22  ;;  %v2538_v33 = vmov -1e+09  }
   0xe   : > { %s547_s27 = scalar_lea.vmem %s2971_s26, %s2642_s23  ;;  %2273 = vmatpush3.bf16.msra.mxu0 %v2461_v3  ;;  %2280 = vmatprep.subr.bf16.mxu1 %v2529_v4  ;;  %s2535_s26 = smov 112   ;;  %v566_v31 = vshrl.u32 %v565_v30, 7  ;;  %v568_v32 = vand.u32 127, %v565_v30  ;;  %v2164_v35 = vld [vmem:[%s554_s0] ss:$0 sm:$0xff]  ;;  %vm729_vm4 = vcmask 1043456  }
   0xf   : > { %v2648_v0 = vld [vmem:[%s547_s27] sm:$0xff]  ;;  %2274 = vmatprep.subr.bf16.mxu0 %v2529_v4  ;;  %2282 = vmatprep.mubr.msk.bf16.mxu1 %vm2530_vm1, %v2529_v4  ;;  %s2963_s27 = smov 72   ;;  %s2966_s0 = smov 8   ;;  %vm1116_vm5 = vcmask 130048   ;;  %vm1118_vm6 = vcmask 195584   ;;  %vm2011_vm7 = vcmask 523264  }
  0x10   : > { %v580_v1 = vmul.f32 %v2648_v0, %v2648_v0  ;;  %vm569_vm3 = vcmp.le.s32.totalorder %v568_v32, %v566_v31 }
  0x11   : > { %v570_v34 = vsel %vm569_vm3, 0.0, %v2538_v33 }
  0x12   : > { %v582_v2 = vsel %vm581_vm0, %v580_v1, 0.0  ;;  %2275 = vmatpush3.bf16.msra.mxu0 %v2462_v5  ;;  %v578_v36 = vadd.f32 %v2164_v35, %v570_v34 }
  0x13   : > { %583 = vadd.xlane.f32.xlu0 %v582_v2  ;;  %2286 = vmatprep.subr.bf16.mxu0 %v2529_v4 }
  0x9c   : > { %v584_v6 = vpop.xlane.xlu0 %583 }
  0x9d   : > { %v586_v7 = vmul.f32 0.03125, %v584_v6 }
  0x9f   : > { %v587_v8 = vadd.f32 1e-06, %v586_v7 }
  0xa1   : > { %2479 = vrsqrt.f32 %v587_v8 }
  0xae   : > { %v2480_v9 = vpop.eup %2479 }
  0xaf   : > { %v589_v11 = vmul.f32 %v2480_v9, %v2648_v0 }
  0xb1   : > { %v596_v12 = vmul.f32 %v2165_v10, %v589_v11 }
  0xb3   : > { %v597_v13 = vpack.c.bf16 %v596_v12, %v596_v12 }
  0xb5   : > { %2277 = vmatmul.mubr.msk.bf16.vlgmr.msra.gmra.mxu0 %vm581_vm0, %v597_v13 }
  0xb6   : > { %2288 = vmatprep.mubr.msk.bf16.mxu0 %vm2530_vm1, %v2529_v4 }
 0x175   : > { %v651_v14 = vpop.f32.mrf.mxu0 }
 0x176   : > { %v2674_v15 = vpack.c.bf16 %v651_v14, %v651_v14 }
 0x177   : > { %v2278_v16 = vpop.f32.mrf.mxu0 }
 0x178   : > { %775 = vrot.lane.b32.xlu1 %v2674_v15, %s2969_s19  ;;  %663 = vrot.lane.b32.xlu0 %v2674_v15, %s2967_s20  ;;  %s2977_s20 = smov 16  }
 0x179   : > { %v654_v17 = vpop.f32.mrf.mxu0 }
 0x17b   : > { %v2279_v18 = vpop.f32.mrf.mxu0 }
 0x17c   : > { %773 = vrot.lane.b32.xlu1 %v2674_v15, %s2533_s24 }
 0x180   : > { %885 = vrot.lane.b32.xlu1 %v2674_v15, %s2968_s25 }
 0x184   : > { %883 = vrot.lane.b32.xlu1 %v2674_v15, %s2535_s26 }
 0x188   : > { %995 = vrot.lane.b32.xlu1 %v2674_v15, %s2963_s27  ;;  %s2965_s27 = smov 16  }
 0x18c   : > { %993 = vrot.lane.b32.xlu1 %v2674_v15, %s2537_s28 }
 0x1ea   : > { %v776_v19 = vpop.permute.xlu1 %775  ;;  %v664_v20 = vpop.permute.xlu0 %663 }
 0x1eb   : > { %v670_v21 = vsel %vm665_vm2, %v664_v20, 0  ;;  %v781_v23 = vsel %vm665_vm2, %v776_v19, 0 }
 0x1ec   : > { %2281 = vmatpush3.bf16.xpose.msra.mxu1 %v670_v21 }
 0x1ed   : > { %2292 = vmatprep.subr.bf16.mxu1 %v2529_v4 }
 0x1ee   : > { %v774_v22 = vpop.permute.xlu1 %773 }
 0x1f2   : > { %v886_v24 = vpop.permute.xlu1 %885 }
 0x1f3   : > { %2283 = vmatmul.mubr.msk.bf16.vlgmr.msra.gmra.mxu1 %vm665_vm2, %v2674_v15  ;;  %v891_v26 = vsel %vm665_vm2, %v886_v24, 0 }
 0x1f4   : > { %2293 = vmatpush3.bf16.xpose.msra.mxu1 %v781_v23  ;;  %2294 = vmatprep.mubr.msk.bf16.mxu1 %vm2530_vm1, %v2529_v4 }
 0x1f5   : > { %2304 = vmatprep.subr.bf16.mxu1 %v2529_v4 }
 0x1f6   : > { %v884_v25 = vpop.permute.xlu1 %883 }
 0x1fa   : > { %v996_v27 = vpop.permute.xlu1 %995 }
 0x1fb   : > { %2295 = vmatmul.mubr.msk.bf16.vlgmr.msra.gmra.mxu1 %vm665_vm2, %v774_v22  ;;  %v1001_v28 = vsel %vm665_vm2, %v996_v27, 0 }
 0x1fc   : > { %2305 = vmatpush3.bf16.xpose.msra.mxu1 %v891_v26  ;;  %2306 = vmatprep.mubr.msk.bf16.mxu1 %vm2530_vm1, %v2529_v4 }
 0x1fd   : > { %2316 = vmatprep.subr.bf16.mxu1 %v2529_v4 }
 0x1fe   : > { %v994_v29 = vpop.permute.xlu1 %993 }
 0x203   : > { %2307 = vmatmul.mubr.msk.bf16.vlgmr.msra.gmra.mxu1 %vm665_vm2, %v884_v25 }
 0x204   : > { %2317 = vmatpush3.bf16.xpose.msra.mxu1 %v1001_v28  ;;  %2318 = vmatprep.mubr.msk.bf16.mxu1 %vm2530_vm1, %v2529_v4 }
 0x205   : > { %2328 = vmatprep.subr.bf16.mxu1 %v2529_v4 }
 0x20b   : > { %2319 = vmatmul.mubr.msk.bf16.vlgmr.msra.gmra.mxu1 %vm665_vm2, %v994_v29 }
 0x20c   : > { %2332 = vmatprep.mubr.msk.bf16.mxu1 %vm2530_vm1, %v2529_v4 }
 0x2b3   : > { %v706_v37 = vpop.f32.mrf.mxu1 }
 0x2b4   : > { %v707_v38 = vadd.f32 %v706_v37, %v578_v36 }
 0x2b5   : > { %v2284_v39 = vpop.f32.mrf.mxu1 }
 0x2b6   : > { %v712_v40 = vsel %vm665_vm2, %v707_v38, -inf }
 0x2b7   : > { %713 = vmax.xlane.f32.xlu1 %v712_v40  ;;  %v709_v41 = vpop.f32.mrf.mxu1 }
 0x2b9   : > { %v2285_v42 = vpop.f32.mrf.mxu1 }
 0x2bb   : > { %v817_v43 = vpop.f32.mrf.mxu1 }
 0x2bc   : > { %v818_v44 = vadd.f32 %v817_v43, %v578_v36 }
 0x2bd   : > { %v2296_v45 = vpop.f32.mrf.mxu1 }
 0x2be   : > { %v823_v46 = vsel %vm665_vm2, %v818_v44, -inf }
 0x2bf   : > { %824 = vmax.xlane.f32.xlu0 %v823_v46  ;;  %v820_v47 = vpop.f32.mrf.mxu1 }
 0x2c1   : > { %v2297_v48 = vpop.f32.mrf.mxu1 }
 0x2c3   : > { %v927_v49 = vpop.f32.mrf.mxu1 }
 0x2c4   : > { %v928_v50 = vadd.f32 %v927_v49, %v578_v36 }
 0x2c5   : > { %v2308_v51 = vpop.f32.mrf.mxu1 }
 0x2c6   : > { %v933_v52 = vsel %vm665_vm2, %v928_v50, -inf  ;;  %v2463_v51 = vld [vmem:[%s2952_s6 + $0x8] sm:$0xff]  }
 0x2c7   : > { %934 = vmax.xlane.f32.xlu0 %v933_v52  ;;  %v930_v53 = vpop.f32.mrf.mxu1  ;;  %2329 = vmatpush3.bf16.msra.mxu1 %v2463_v51  ;;  %v2464_v52 = vld [vmem:[%s2952_s6] sm:$0xff]  }
 0x2c8   : > { %2330 = vmatprep.subr.bf16.mxu1 %v2529_v4 }
 0x2c9   : > { %v2309_v54 = vpop.f32.mrf.mxu1 }
 0x2cb   : > { %v1037_v55 = vpop.f32.mrf.mxu1  ;;  %2331 = vmatpush3.bf16.msra.mxu1 %v2464_v52 }
 0x2cc   : > { %v1038_v56 = vadd.f32 %v1037_v55, %v578_v36  ;;  %2344 = vmatprep.subr.bf16.mxu1 %v2529_v4 }
 0x2cd   : > { %v2320_v57 = vpop.f32.mrf.mxu1 }
 0x2ce   : > { %v1043_v58 = vsel %vm665_vm2, %v1038_v56, -inf }
 0x2cf   : > { %1044 = vmax.xlane.f32.xlu1 %v1043_v58  ;;  %v1040_v59 = vpop.f32.mrf.mxu1 }
 0x2d1   : > { %v2321_v60 = vpop.f32.mrf.mxu1 }
 0x340   : > { %v714_v61 = vpop.xlane.xlu1 %713 }
 0x341   : > { %v715_v62 = vsub.f32 %v707_v38, %v714_v61 }
 0x343   : > { %v716_v63 = vmul.f32 1.442695, %v715_v62 }
 0x345   : > { %2481 = vpow2.f32 %v716_v63 }
 0x348   : > { %v825_v1 = vpop.xlane.xlu0 %824 }
 0x349   : > { %v826_v2 = vsub.f32 %v818_v44, %v825_v1 }
 0x34b   : > { %v827_v3 = vmul.f32 1.442695, %v826_v2 }
 0x34d   : > { %2483 = vpow2.f32 %v827_v3 }
 0x350   : > { %v935_v5 = vpop.xlane.xlu0 %934 }
 0x351   : > { %v936_v6 = vsub.f32 %v928_v50, %v935_v5 }
 0x352   : > { %v2482_v7 = vpop.eup %2481 }
 0x353   : > { %v937_v8 = vmul.f32 1.442695, %v936_v6  ;;  %v718_v9 = vsel %vm665_vm2, %v2482_v7, 0.0 }
 0x354   : > { %719 = vadd.xlane.f32.xlu0 %v718_v9 }
 0x355   : > { %2485 = vpow2.f32 %v937_v8 }
 0x358   : > { %v1045_v14 = vpop.xlane.xlu1 %1044 }
 0x359   : > { %v1046_v16 = vsub.f32 %v1038_v56, %v1045_v14 }
 0x35a   : > { %v2484_v10 = vpop.eup %2483 }
 0x35b   : > { %v829_v11 = vsel %vm665_vm2, %v2484_v10, 0.0  ;;  %v1047_v17 = vmul.f32 1.442695, %v1046_v16  ;;  %v2467_v16 = vld [vmem:[%s2954_s8 + $0x8] sm:$0xff]  }
 0x35c   : > { %830 = vadd.xlane.f32.xlu1 %v829_v11 }
 0x35d   : > { %2487 = vpow2.f32 %v1047_v17 }
 0x362   : > { %v2486_v12 = vpop.eup %2485 }
 0x363   : > { %v939_v13 = vsel %vm665_vm2, %v2486_v12, 0.0 }
 0x364   : > { %940 = vadd.xlane.f32.xlu0 %v939_v13  ;;  %v2465_v13 = vld [vmem:[%s2955_s9 + $0x8] sm:$0xff]  }
 0x36a   : > { %v2488_v18 = vpop.eup %2487 }
 0x36b   : > { %v1049_v19 = vsel %vm665_vm2, %v2488_v18, 0.0 }
 0x36d   : > { %835 = vrot.lane.b32.xlu1 %v2674_v15, %s2539_s17  ;;  %s2964_s17 = smov 24  }
 0x37a   : > { %724 = vrot.lane.b32.xlu0 %v2674_v15, %s2540_s18 }
 0x37e   : > { %1055 = vrot.lane.b32.xlu0 %v2674_v15, %s2541_s29  ;;  %s561_s29 = scalar_lea.vmem %s2962_s16, %s2642_s23 }
 0x391   : > { %1050 = vadd.xlane.f32.xlu1 %v1049_v19 }
 0x3a2   : > { %945 = vrot.lane.b32.xlu1 %v2674_v15, %s2542_s30  ;;  %s551_s30 = scalar_lea.vmem %s2947_s1, %s2642_s23 }
 0x3a3   : > { %v564_v14 = vld [vmem:[%s551_s30] sm:$0xff] }
 0x3a4   : > { %v1253_v17 = vpack.c.bf16 %v564_v14, %v564_v14 }
 0x3dd   : > { %v720_v20 = vpop.xlane.xlu0 %719 }
 0x3de   : > { %2489 = vrcp.f32 %v720_v20 }
 0x3e5   : > { %v831_v21 = vpop.xlane.xlu1 %830 }
 0x3e6   : > { %2491 = vrcp.f32 %v831_v21 }
 0x3e9   : > { %v836_v27 = vpop.permute.xlu1 %835 }
 0x3ea   : > { %v841_v30 = vsel %vm729_vm4, %v836_v27, 0 }
 0x3eb   : > { %v2490_v22 = vpop.eup %2489 }
 0x3ec   : > { %v722_v24 = vmul.f32 %v2490_v22, %v2482_v7 }
 0x3ed   : > { %v941_v23 = vpop.xlane.xlu0 %940 }
 0x3ee   : > { %v723_v28 = vpack.c.bf16 %v722_v24, %v722_v24  ;;  %2493 = vrcp.f32 %v941_v23  ;;  %v2180_v23 = vld [vmem:[%s2953_s7] ss:$0 sm:$0xff] }
 0x3f1   : > { %v725_v25 = vpop.permute.xlu0 %724 }
 0x3f2   : > { %v731_v26 = vsel %vm729_vm4, %v725_v25, 0 }
 0x3f3   : > { %2287 = vmatpush3.bf16.msra.mxu0 %v731_v26  ;;  %v2492_v29 = vpop.eup %2491 }
 0x3f4   : > { %2298 = vmatprep.subr.bf16.mxu0 %v2529_v4  ;;  %v833_v15 = vmul.f32 %v2492_v29, %v2484_v10 }
 0x3f5   : > { %v1056_v37 = vpop.permute.xlu0 %1055 }
 0x3f6   : > { %2289 = vmatmul.mubr.msk.bf16.vlgmr.msra.gmra.mxu0 %vm665_vm2, %v723_v28  ;;  %v834_v31 = vpack.c.bf16 %v833_v15, %v833_v15  ;;  %v1061_v39 = vsel %vm729_vm4, %v1056_v37, 0 }
 0x3f7   : > { %2299 = vmatpush3.bf16.msra.mxu0 %v841_v30  ;;  %2300 = vmatprep.mubr.msk.bf16.mxu0 %vm2530_vm1, %v2529_v4 }
 0x3f8   : > { %2310 = vmatprep.subr.bf16.mxu0 %v2529_v4 }
 0x3fb   : > { %v2494_v32 = vpop.eup %2493 }
 0x3fc   : > { %v943_v34 = vmul.f32 %v2494_v32, %v2486_v12 }
 0x3fe   : > { %2301 = vmatmul.mubr.msk.bf16.vlgmr.msra.gmra.mxu0 %vm665_vm2, %v834_v31  ;;  %v944_v38 = vpack.c.bf16 %v943_v34, %v943_v34 }
 0x3ff   : > { %2312 = vmatprep.mubr.msk.bf16.mxu0 %vm2530_vm1, %v2529_v4 }
 0x41a   : > { %v1051_v33 = vpop.xlane.xlu1 %1050 }
 0x41b   : > { %2495 = vrcp.f32 %v1051_v33 }
 0x41e   : > { %v946_v35 = vpop.permute.xlu1 %945 }
 0x41f   : > { %v951_v36 = vsel %vm729_vm4, %v946_v35, 0 }
 0x420   : > { %2311 = vmatpush3.bf16.msra.mxu0 %v951_v36 }
 0x421   : > { %2322 = vmatprep.subr.bf16.mxu0 %v2529_v4 }
 0x423   : > { %2313 = vmatmul.mubr.msk.bf16.vlgmr.msra.gmra.mxu0 %vm665_vm2, %v944_v38 }
 0x424   : > { %2323 = vmatpush3.bf16.msra.mxu0 %v1061_v39  ;;  %2324 = vmatprep.mubr.msk.bf16.mxu0 %vm2530_vm1, %v2529_v4 }
 0x425   : > { %2336 = vmatprep.subr.bf16.mxu0 %v2529_v4 }
 0x428   : > { %v2496_v40 = vpop.eup %2495 }
 0x429   : > { %v1053_v41 = vmul.f32 %v2496_v40, %v2488_v18  ;;  %v2468_v18 = vld [vmem:[%s2954_s8] sm:$0xff]  }
 0x42b   : > { %v1054_v42 = vpack.c.bf16 %v1053_v41, %v1053_v41 }
 0x42d   : > { %2325 = vmatmul.mubr.msk.bf16.vlgmr.msra.gmra.mxu0 %vm665_vm2, %v1054_v42 }
 0x42e   : > { %2340 = vmatprep.mubr.msk.bf16.mxu0 %vm2530_vm1, %v2529_v4  ;;  %2337 = vmatpush3.bf16.msra.mxu0 %v2467_v16 }
 0x42f   : > { %2338 = vmatprep.subr.bf16.mxu0 %v2529_v4 }
 0x432   : > { %2339 = vmatpush3.bf16.msra.mxu0 %v2468_v18 }
 0x433   : > { %2352 = vmatprep.subr.bf16.mxu0 %v2529_v4 }
 0x4b6   : > { %v767_v43 = vpop.f32.mrf.mxu0 }
 0x4b8   : > { %v2290_v44 = vpop.f32.mrf.mxu0 }
 0x4ba   : > { %v770_v45 = vpop.f32.mrf.mxu0 }
 0x4bc   : > { %v2291_v46 = vpop.f32.mrf.mxu0 }
 0x4be   : > { %v877_v47 = vpop.f32.mrf.mxu0 }
 0x4bf   : > { %1104 = vrot.lane.b32.xlu1 %v877_v47, %s2966_s0  ;;  %s2975_s0 = smov 72  }
 0x4c0   : > { %v2302_v48 = vpop.f32.mrf.mxu0 }
 0x4c2   : > { %v880_v49 = vpop.f32.mrf.mxu0 }
 0x4c4   : > { %v2303_v50 = vpop.f32.mrf.mxu0 }
 0x4e3   : > { %v987_v53 = vpop.f32.mrf.mxu0 }
 0x4e4   : > { %1108 = vrot.lane.b32.xlu0 %v987_v53, %s2965_s27  ;;  %s2972_s27 = smov 88  }
 0x4e5   : > { %v2314_v54 = vpop.f32.mrf.mxu0 }
 0x4e7   : > { %v990_v55 = vpop.f32.mrf.mxu0 }
 0x4e9   : > { %v2315_v56 = vpop.f32.mrf.mxu0 }
 0x4ed   : > { %v1097_v57 = vpop.f32.mrf.mxu0 }
 0x4ee   : > { %1112 = vrot.lane.b32.xlu1 %v1097_v57, %s2964_s17  ;;  %s2976_s17 = smov 8  }
 0x4ef   : > { %v2326_v58 = vpop.f32.mrf.mxu0 }
 0x4f1   : > { %v1100_v59 = vpop.f32.mrf.mxu0 }
 0x4f3   : > { %v2327_v60 = vpop.f32.mrf.mxu0 }
 0x531   : > { %v1105_v61 = vpop.permute.xlu1 %1104 }
 0x532   : > { %v1115_v63 = vsel %vm665_vm2, %v767_v43, %v1105_v61 }
 0x556   : > { %v1109_v62 = vpop.permute.xlu0 %1108 }
 0x557   : > { %v1117_v1 = vsel %vm1116_vm5, %v1115_v63, %v1109_v62 }
 0x560   : > { %v1113_v2 = vpop.permute.xlu1 %1112 }
 0x561   : > { %v1119_v3 = vsel %vm1118_vm6, %v1117_v1, %v1113_v2 }
 0x562   : > { %v1120_v5 = vpack.c.bf16 %v1119_v3, %v1119_v3 }
 0x564   : > { %2333 = vmatmul.mubr.msk.bf16.vlgmr.msra.gmra.mxu1 %vm581_vm0, %v1120_v5 }
 0x565   : > { %2348 = vmatprep.mubr.msk.bf16.mxu1 %vm2530_vm1, %v2529_v4  ;;  %2345 = vmatpush3.bf16.msra.mxu1 %v2465_v13 }
 0x566   : > { %2346 = vmatprep.subr.bf16.mxu1 %v2529_v4 }
 0x624   : > { %v1170_v6 = vpop.f32.mrf.mxu1 }
 0x625   : > { %v2765_v7 = vadd.f32 %v1170_v6, %v2648_v0  ;;  %v2466_v0 = vld [vmem:[%s2955_s9] sm:$0xff]  }
 0x626   : > { %v2334_v8 = vpop.f32.mrf.mxu1  ;;  %2347 = vmatpush3.bf16.msra.mxu1 %v2466_v0 }
 0x627   : > { %v1178_v9 = vmul.f32 %v2765_v7, %v2765_v7  ;;  %2358 = vmatprep.subr.bf16.mxu1 %v2529_v4 }
 0x628   : > { %v1173_v10 = vpop.f32.mrf.mxu1 }
 0x629   : > { %v1179_v11 = vsel %vm581_vm0, %v1178_v9, 0.0  ;;  %2349 = vmatmul.mubr.msk.bf16.vlgmr.msra.gmra.mxu1 %vm581_vm0, %v1253_v17 }
 0x62a   : > { %1180 = vadd.xlane.f32.xlu0 %v1179_v11  ;;  %v2335_v12 = vpop.f32.mrf.mxu1  ;;  %2360 = vmatprep.mubr.msk.bf16.mxu1 %vm2530_vm1, %v2529_v4 }
 0x6b3   : > { %v1181_v19 = vpop.xlane.xlu0 %1180 }
 0x6b4   : > { %v1182_v20 = vmul.f32 0.03125, %v1181_v19 }
 0x6b6   : > { %v1183_v21 = vadd.f32 1e-06, %v1182_v20 }
 0x6b8   : > { %2497 = vrsqrt.f32 %v1183_v21 }
 0x6c5   : > { %v2498_v22 = vpop.eup %2497 }
 0x6c6   : > { %v1185_v24 = vmul.f32 %v2498_v22, %v2765_v7 }
 0x6c8   : > { %v1192_v25 = vmul.f32 %v2180_v23, %v1185_v24 }
 0x6ca   : > { %v1193_v26 = vpack.c.bf16 %v1192_v25, %v1192_v25 }
 0x6cc   : > { %2341 = vmatmul.mubr.msk.bf16.vlgmr.msra.gmra.mxu0 %vm581_vm0, %v1193_v26 }
 0x6cd   : > { %2354 = vmatprep.mubr.msk.bf16.mxu0 %vm2530_vm1, %v2529_v4 }
 0x6e9   : > { %v1307_v27 = vpop.f32.mrf.mxu1 }
 0x6ea   : > { %v2800_v28 = vpack.c.bf16 %v1307_v27, %v1307_v27 }
 0x6eb   : > { %v2350_v29 = vpop.f32.mrf.mxu1 }
 0x6ec   : > { %1436 = vrot.lane.b32.xlu1 %v2800_v28, %s2533_s24  ;;  %v1330_v30 = vsel %vm665_vm2, %v2800_v28, 0 }
 0x6ed   : > { %v1310_v15 = vpop.f32.mrf.mxu1  ;;  %2353 = vmatpush3.bf16.xpose.msra.mxu0 %v1330_v30 }
 0x6ee   : > { %2364 = vmatprep.subr.bf16.mxu0 %v2529_v4 }
 0x6ef   : > { %v2351_v31 = vpop.f32.mrf.mxu1 }
 0x6f0   : > { %1546 = vrot.lane.b32.xlu1 %v2800_v28, %s2535_s26 }
 0x75e   : > { %v1437_v33 = vpop.permute.xlu1 %1436 }
 0x75f   : > { %v1442_v35 = vsel %vm665_vm2, %v1437_v33, 0 }
 0x762   : > { %v1547_v39 = vpop.permute.xlu1 %1546 }
 0x763   : > { %v1552_v41 = vsel %vm665_vm2, %v1547_v39, 0 }
 0x78c   : > { %v1247_v32 = vpop.f32.mrf.mxu0 }
 0x78d   : > { %v1318_v34 = vpack.c.bf16 %v1247_v32, %v1247_v32 }
 0x78e   : > { %v2342_v36 = vpop.f32.mrf.mxu0 }
 0x78f   : > { %1434 = vrot.lane.b32.xlu1 %v1318_v34, %s2533_s24  ;;  %2355 = vmatmul.mubr.msk.bf16.vlgmr.msra.gmra.mxu0 %vm665_vm2, %v1318_v34  ;;  %s2978_s24 = smov 24  }
 0x790   : > { %v1250_v37 = vpop.f32.mrf.mxu0  ;;  %2365 = vmatpush3.bf16.xpose.msra.mxu0 %v1442_v35  ;;  %2366 = vmatprep.mubr.msk.bf16.mxu0 %vm2530_vm1, %v2529_v4 }
 0x791   : > { %2376 = vmatprep.subr.bf16.mxu0 %v2529_v4 }
 0x792   : > { %v2343_v38 = vpop.f32.mrf.mxu0 }
 0x793   : > { %1544 = vrot.lane.b32.xlu1 %v1318_v34, %s2535_s26  ;;  %s557_s26 = scalar_lea.vmem %s2949_s3, %s2980_s22  ;;  %s2974_s22 = smov 96  }
 0x794   : > { %v2187_v46 = vld [vmem:[%s557_s26] ss:$0 sm:$0xff] }
 0x797   : > { %1656 = vrot.lane.b32.xlu1 %v2800_v28, %s2537_s28 }
 0x79b   : > { %1654 = vrot.lane.b32.xlu1 %v1318_v34, %s2537_s28  ;;  %s2973_s28 = smov 80  }
 0x801   : > { %v1435_v40 = vpop.permute.xlu1 %1434 }
 0x802   : > { %2367 = vmatmul.mubr.msk.bf16.vlgmr.msra.gmra.mxu0 %vm665_vm2, %v1435_v40 }
 0x803   : > { %2377 = vmatpush3.bf16.xpose.msra.mxu0 %v1552_v41  ;;  %2378 = vmatprep.mubr.msk.bf16.mxu0 %vm2530_vm1, %v2529_v4 }
 0x804   : > { %2388 = vmatprep.subr.bf16.mxu0 %v2529_v4 }
 0x805   : > { %v1545_v42 = vpop.permute.xlu1 %1544 }
 0x809   : > { %v1657_v43 = vpop.permute.xlu1 %1656 }
 0x80a   : > { %v1662_v44 = vsel %vm665_vm2, %v1657_v43, 0  ;;  %2379 = vmatmul.mubr.msk.bf16.vlgmr.msra.gmra.mxu0 %vm665_vm2, %v1545_v42 }
 0x80b   : > { %2389 = vmatpush3.bf16.xpose.msra.mxu0 %v1662_v44  ;;  %2390 = vmatprep.mubr.msk.bf16.mxu0 %vm2530_vm1, %v2529_v4 }
 0x80c   : > { %2400 = vmatprep.subr.bf16.mxu0 %v2529_v4 }
 0x80d   : > { %v1655_v45 = vpop.permute.xlu1 %1654 }
 0x812   : > { %2391 = vmatmul.mubr.msk.bf16.vlgmr.msra.gmra.mxu0 %vm665_vm2, %v1655_v45 }
 0x813   : > { %2404 = vmatprep.mubr.msk.bf16.mxu0 %vm2530_vm1, %v2529_v4 }
 0x84f   : > { %v1366_v47 = vpop.f32.mrf.mxu0 }
 0x850   : > { %v1367_v48 = vadd.f32 %v2187_v46, %v1366_v47 }
 0x851   : > { %v2356_v49 = vpop.f32.mrf.mxu0 }
 0x852   : > { %v1372_v50 = vsel %vm665_vm2, %v1367_v48, -inf }
 0x853   : > { %1373 = vmax.xlane.f32.xlu1 %v1372_v50  ;;  %v1369_v51 = vpop.f32.mrf.mxu0 }
 0x855   : > { %v2357_v52 = vpop.f32.mrf.mxu0 }
 0x864   : > { %1496 = vrot.lane.b32.xlu1 %v2800_v28, %s2972_s27 }
 0x868   : > { %1606 = vrot.lane.b32.xlu1 %v2800_v28, %s2973_s28 }
 0x8c2   : > { %v1478_v53 = vpop.f32.mrf.mxu0 }
 0x8c3   : > { %v1479_v54 = vadd.f32 %v2187_v46, %v1478_v53 }
 0x8c4   : > { %v2368_v55 = vpop.f32.mrf.mxu0 }
 0x8c5   : > { %v1484_v56 = vsel %vm665_vm2, %v1479_v54, -inf }
 0x8c6   : > { %1485 = vmax.xlane.f32.xlu0 %v1484_v56  ;;  %v1481_v57 = vpop.f32.mrf.mxu0 }
 0x8c8   : > { %v2369_v58 = vpop.f32.mrf.mxu0 }
 0x8ca   : > { %v1588_v59 = vpop.f32.mrf.mxu0 }
 0x8cb   : > { %v1589_v60 = vadd.f32 %v2187_v46, %v1588_v59 }
 0x8cc   : > { %v2380_v61 = vpop.f32.mrf.mxu0 }
 0x8cd   : > { %v1594_v62 = vsel %vm665_vm2, %v1589_v60, -inf  ;;  %v2469_v61 = vld [vmem:[%s2956_s10 + $0x8] sm:$0xff]  }
 0x8ce   : > { %1595 = vmax.xlane.f32.xlu0 %v1594_v62  ;;  %v1591_v63 = vpop.f32.mrf.mxu0  ;;  %2401 = vmatpush3.bf16.msra.mxu0 %v2469_v61  ;;  %v2470_v62 = vld [vmem:[%s2956_s10] sm:$0xff]  }
 0x8cf   : > { %2402 = vmatprep.subr.bf16.mxu0 %v2529_v4 }
 0x8d0   : > { %v2381_v1 = vpop.f32.mrf.mxu0 }
 0x8d2   : > { %v1698_v2 = vpop.f32.mrf.mxu0  ;;  %2403 = vmatpush3.bf16.msra.mxu0 %v2470_v62 }
 0x8d3   : > { %v1699_v3 = vadd.f32 %v2187_v46, %v1698_v2  ;;  %2416 = vmatprep.subr.bf16.mxu0 %v2529_v4 }
 0x8d4   : > { %v2392_v5 = vpop.f32.mrf.mxu0 }
 0x8d5   : > { %v1704_v6 = vsel %vm665_vm2, %v1699_v3, -inf }
 0x8d6   : > { %1705 = vmax.xlane.f32.xlu0 %v1704_v6  ;;  %v1701_v8 = vpop.f32.mrf.mxu0 }
 0x8d8   : > { %v2393_v9 = vpop.f32.mrf.mxu0 }
 0x8dc   : > { %v1374_v10 = vpop.xlane.xlu1 %1373 }
 0x8dd   : > { %v1375_v11 = vsub.f32 %v1367_v48, %v1374_v10 }
 0x8df   : > { %v1376_v12 = vmul.f32 1.442695, %v1375_v11 }
 0x8e0   : > { %v1497_v36 = vpop.permute.xlu1 %1496 }
 0x8e1   : > { %2499 = vpow2.f32 %v1376_v12  ;;  %v1502_v38 = vsel %vm729_vm4, %v1497_v36, 0  ;;  %v2476_v36 = vld [vmem:[%s2960_s14 + $0x10] sm:$0xff]  }
 0x8e4   : > { %v1607_v40 = vpop.permute.xlu1 %1606 }
 0x8e5   : > { %v1612_v42 = vsel %vm729_vm4, %v1607_v40, 0 }
 0x8ee   : > { %v2500_v13 = vpop.eup %2499 }
 0x8ef   : > { %v1378_v14 = vsel %vm665_vm2, %v2500_v13, 0.0 }
 0x8f0   : > { %1379 = vadd.xlane.f32.xlu0 %v1378_v14 }
 0x94f   : > { %v1486_v0 = vpop.xlane.xlu0 %1485 }
 0x950   : > { %v1487_v16 = vsub.f32 %v1479_v54, %v1486_v0 }
 0x952   : > { %v1488_v17 = vmul.f32 1.442695, %v1487_v16 }
 0x954   : > { %2501 = vpow2.f32 %v1488_v17 }
 0x957   : > { %v1596_v20 = vpop.xlane.xlu0 %1595 }
 0x958   : > { %v1597_v21 = vsub.f32 %v1589_v60, %v1596_v20 }
 0x95a   : > { %v1598_v23 = vmul.f32 1.442695, %v1597_v21 }
 0x95c   : > { %2503 = vpow2.f32 %v1598_v23 }
 0x95f   : > { %v1706_v22 = vpop.xlane.xlu0 %1705 }
 0x960   : > { %v1707_v24 = vsub.f32 %v1699_v3, %v1706_v22 }
 0x961   : > { %v2502_v18 = vpop.eup %2501 }
 0x962   : > { %v1490_v19 = vsel %vm665_vm2, %v2502_v18, 0.0  ;;  %v1708_v25 = vmul.f32 1.442695, %v1707_v24  ;;  %v2471_v24 = vld [vmem:[%s2958_s12 + $0x8] sm:$0xff]  }
 0x963   : > { %1491 = vadd.xlane.f32.xlu0 %v1490_v19 }
 0x964   : > { %2505 = vpow2.f32 %v1708_v25  ;;  %v2472_v25 = vld [vmem:[%s2959_s13 + $0x8] sm:$0xff]  }
 0x969   : > { %v2504_v26 = vpop.eup %2503 }
 0x96a   : > { %v1600_v27 = vsel %vm665_vm2, %v2504_v26, 0.0 }
 0x971   : > { %v2506_v29 = vpop.eup %2505 }
 0x972   : > { %v1710_v30 = vsel %vm665_vm2, %v2506_v29, 0.0 }
 0x979   : > { %1385 = vrot.lane.b32.xlu0 %v2800_v28, %s2974_s22  ;;  %v1380_v15 = vpop.xlane.xlu0 %1379 }
 0x97a   : > { %2507 = vrcp.f32 %v1380_v15 }
 0x987   : > { %v2508_v31 = vpop.eup %2507 }
 0x988   : > { %v1382_v33 = vmul.f32 %v2508_v31, %v2500_v13  ;;  %v2199_v31 = vld [vmem:[%s2957_s11] ss:$0 sm:$0xff] }
 0x98a   : > { %v1383_v37 = vpack.c.bf16 %v1382_v33, %v1382_v33 }
 0x998   : > { %1601 = vadd.xlane.f32.xlu0 %v1600_v27 }
 0x99c   : > { %1711 = vadd.xlane.f32.xlu0 %v1710_v30 }
 0x9b2   : > { %1716 = vrot.lane.b32.xlu0 %v2800_v28, %s2975_s0 }
 0x9ec   : > { %v1492_v32 = vpop.xlane.xlu0 %1491 }
 0x9ed   : > { %2509 = vrcp.f32 %v1492_v32 }
 0x9f0   : > { %v1386_v34 = vpop.permute.xlu0 %1385 }
 0x9f1   : > { %v1391_v35 = vsel %vm729_vm4, %v1386_v34, 0 }
 0x9f2   : > { %2359 = vmatpush3.bf16.msra.mxu1 %v1391_v35  ;;  %v2475_v35 = vld [vmem:[%s2960_s14 + $0x18] sm:$0xff]  }
 0x9f3   : > { %2370 = vmatprep.subr.bf16.mxu1 %v2529_v4 }
 0x9f5   : > { %2361 = vmatmul.mubr.msk.bf16.vlgmr.msra.gmra.mxu1 %vm665_vm2, %v1383_v37  ;;  %v2477_v37 = vld [vmem:[%s2960_s14 + $0x8] sm:$0xff]  }
 0x9f6   : > { %2371 = vmatpush3.bf16.msra.mxu1 %v1502_v38  ;;  %2372 = vmatprep.mubr.msk.bf16.mxu1 %vm2530_vm1, %v2529_v4  ;;  %v2478_v38 = vld [vmem:[%s2960_s14] sm:$0xff]  }
 0x9f7   : > { %2382 = vmatprep.subr.bf16.mxu1 %v2529_v4 }
 0x9fa   : > { %v2510_v28 = vpop.eup %2509 }
 0x9fb   : > { %v1494_v39 = vmul.f32 %v2510_v28, %v2502_v18 }
 0x9fd   : > { %v1495_v41 = vpack.c.bf16 %v1494_v39, %v1494_v39 }
 0x9ff   : > { %2373 = vmatmul.mubr.msk.bf16.vlgmr.msra.gmra.mxu1 %vm665_vm2, %v1495_v41 }
 0xa00   : > { %2383 = vmatpush3.bf16.msra.mxu1 %v1612_v42  ;;  %2384 = vmatprep.mubr.msk.bf16.mxu1 %vm2530_vm1, %v2529_v4 }
 0xa01   : > { %2394 = vmatprep.subr.bf16.mxu1 %v2529_v4 }
 0xa21   : > { %v1602_v43 = vpop.xlane.xlu0 %1601 }
 0xa22   : > { %2511 = vrcp.f32 %v1602_v43 }
 0xa25   : > { %v1712_v44 = vpop.xlane.xlu0 %1711 }
 0xa26   : > { %2513 = vrcp.f32 %v1712_v44 }
 0xa29   : > { %v1717_v47 = vpop.permute.xlu0 %1716 }
 0xa2a   : > { %v1722_v50 = vsel %vm729_vm4, %v1717_v47, 0 }
 0xa2f   : > { %v2512_v45 = vpop.eup %2511 }
 0xa30   : > { %v1604_v46 = vmul.f32 %v2512_v45, %v2504_v26  ;;  %v2474_v26 = vld [vmem:[%s2959_s13] sm:$0xff]  }
 0xa32   : > { %v1605_v48 = vpack.c.bf16 %v1604_v46, %v1604_v46 }
 0xa33   : > { %v2514_v49 = vpop.eup %2513 }
 0xa34   : > { %2385 = vmatmul.mubr.msk.bf16.vlgmr.msra.gmra.mxu1 %vm665_vm2, %v1605_v48  ;;  %v1714_v51 = vmul.f32 %v2514_v49, %v2506_v29 }
 0xa35   : > { %2395 = vmatpush3.bf16.msra.mxu1 %v1722_v50  ;;  %2396 = vmatprep.mubr.msk.bf16.mxu1 %vm2530_vm1, %v2529_v4 }
 0xa36   : > { %2408 = vmatprep.subr.bf16.mxu1 %v2529_v4  ;;  %v1715_v52 = vpack.c.bf16 %v1714_v51, %v1714_v51 }
 0xa3c   : > { %2397 = vmatmul.mubr.msk.bf16.vlgmr.msra.gmra.mxu1 %vm665_vm2, %v1715_v52 }
 0xa3d   : > { %2412 = vmatprep.mubr.msk.bf16.mxu1 %vm2530_vm1, %v2529_v4  ;;  %2409 = vmatpush3.bf16.msra.mxu1 %v2471_v24 }
 0xa3e   : > { %2410 = vmatprep.subr.bf16.mxu1 %v2529_v4 }
 0xab5   : > { %v1427_v53 = vpop.f32.mrf.mxu1 }
 0xab7   : > { %v2362_v54 = vpop.f32.mrf.mxu1 }
 0xab9   : > { %v1430_v55 = vpop.f32.mrf.mxu1 }
 0xabb   : > { %v2363_v56 = vpop.f32.mrf.mxu1 }
 0xabf   : > { %v1538_v57 = vpop.f32.mrf.mxu1 }
 0xac0   : > { %1765 = vrot.lane.b32.xlu1 %v1538_v57, %s2976_s17 }
 0xac1   : > { %v2374_v58 = vpop.f32.mrf.mxu1 }
 0xac3   : > { %v1541_v59 = vpop.f32.mrf.mxu1 }
 0xac5   : > { %v2375_v60 = vpop.f32.mrf.mxu1 }
 0xaf4   : > { %v1648_v63 = vpop.f32.mrf.mxu1 }
 0xaf5   : > { %1769 = vrot.lane.b32.xlu0 %v1648_v63, %s2977_s20 }
 0xaf6   : > { %v2386_v1 = vpop.f32.mrf.mxu1 }
 0xaf8   : > { %v1651_v2 = vpop.f32.mrf.mxu1 }
 0xafa   : > { %v2387_v3 = vpop.f32.mrf.mxu1 }
 0xafc   : > { %v1758_v5 = vpop.f32.mrf.mxu1 }
 0xafd   : > { %1773 = vrot.lane.b32.xlu1 %v1758_v5, %s2978_s24  ;;  %v2211_v5 = vld [vmem:[%s2961_s15] ss:$0 sm:$0xff] }
 0xafe   : > { %v2398_v6 = vpop.f32.mrf.mxu1 }
 0xb00   : > { %v1761_v8 = vpop.f32.mrf.mxu1 }
 0xb02   : > { %v2399_v9 = vpop.f32.mrf.mxu1 }
 0xb32   : > { %v1766_v10 = vpop.permute.xlu1 %1765 }
 0xb33   : > { %v1776_v12 = vsel %vm665_vm2, %v1427_v53, %v1766_v10 }
 0xb67   : > { %v1770_v11 = vpop.permute.xlu0 %1769 }
 0xb68   : > { %v1777_v13 = vsel %vm1116_vm5, %v1776_v12, %v1770_v11 }
 0xb6f   : > { %v1774_v14 = vpop.permute.xlu1 %1773 }
 0xb70   : > { %v1778_v0 = vsel %vm1118_vm6, %v1777_v13, %v1774_v14 }
 0xb71   : > { %v1779_v16 = vpack.c.bf16 %v1778_v0, %v1778_v0 }
 0xb73   : > { %2405 = vmatmul.mubr.msk.bf16.vlgmr.msra.gmra.mxu0 %vm581_vm0, %v1779_v16 }
 0xb74   : > { %2420 = vmatprep.mubr.msk.bf16.mxu0 %vm2530_vm1, %v2529_v4  ;;  %2417 = vmatpush3.bf16.msra.mxu0 %v2472_v25 }
 0xb75   : > { %2418 = vmatprep.subr.bf16.mxu0 %v2529_v4 }
 0xb78   : > { %2419 = vmatpush3.bf16.msra.mxu0 %v2474_v26 }
 0xc33   : > { %v1829_v17 = vpop.f32.mrf.mxu0 }
 0xc34   : > { %v2890_v18 = vadd.f32 %v1829_v17, %v2765_v7  ;;  %v2473_v7 = vld [vmem:[%s2958_s12] sm:$0xff]  }
 0xc35   : > { %v2406_v19 = vpop.f32.mrf.mxu0  ;;  %2411 = vmatpush3.bf16.msra.mxu1 %v2473_v7 }
 0xc36   : > { %v1853_v20 = vmul.f32 %v2890_v18, %v2890_v18  ;;  %2424 = vmatprep.subr.bf16.mxu1 %v2529_v4 }
 0xc37   : > { %v1832_v21 = vpop.f32.mrf.mxu0 }
 0xc38   : > { %v1854_v22 = vsel %vm581_vm0, %v1853_v20, 0.0 }
 0xc39   : > { %1855 = vadd.xlane.f32.xlu0 %v1854_v22  ;;  %v2407_v23 = vpop.f32.mrf.mxu0 }
 0xcc2   : > { %v1856_v27 = vpop.xlane.xlu0 %1855 }
 0xcc3   : > { %v1857_v29 = vmul.f32 0.03125, %v1856_v27 }
 0xcc5   : > { %v1858_v30 = vadd.f32 1e-06, %v1857_v29 }
 0xcc7   : > { %2515 = vrsqrt.f32 %v1858_v30 }
 0xcd4   : > { %v2516_v15 = vpop.eup %2515 }
 0xcd5   : > { %v1860_v32 = vmul.f32 %v2516_v15, %v2890_v18 }
 0xcd7   : > { %v1867_v33 = vmul.f32 %v2199_v31, %v1860_v32 }
 0xcd9   : > { %v1868_v34 = vpack.c.bf16 %v1867_v33, %v1867_v33 }
 0xcdb   : > { %2413 = vmatmul.mubr.msk.bf16.vlgmr.msra.gmra.mxu1 %vm581_vm0, %v1868_v34  ;;  %2421 = vmatmul.mubr.msk.bf16.vlgmr.msra.gmra.mxu0 %vm581_vm0, %v1868_v34 }
 0xcdc   : > { %2432 = vmatprep.mubr.msk.bf16.mxu1 %vm2530_vm1, %v2529_v4  ;;  %2425 = vmatpush3.bf16.msra.mxu1 %v2475_v35 }
 0xcdd   : > { %2426 = vmatprep.subr.bf16.mxu1 %v2529_v4 }
 0xce0   : > { %2427 = vmatpush3.bf16.msra.mxu1 %v2476_v36 }
 0xce1   : > { %2428 = vmatprep.subr.bf16.mxu1 %v2529_v4 }
 0xce4   : > { %2429 = vmatpush3.bf16.msra.mxu1 %v2477_v37 }
 0xce5   : > { %2430 = vmatprep.subr.bf16.mxu1 %v2529_v4 }
 0xce8   : > { %2431 = vmatpush3.bf16.msra.mxu1 %v2478_v38 }
 0xd9b   : > { %v1918_v28 = vpop.f32.mrf.mxu1  ;;  %v1979_v39 = vpop.f32.mrf.mxu0 }
 0xd9c   : > { %v1924_v40 = vmul.f32 %v1918_v28, %v1918_v28 }
 0xd9d   : > { %v2414_v41 = vpop.f32.mrf.mxu1  ;;  %v2422_v42 = vpop.f32.mrf.mxu0 }
 0xd9e   : > { %v1925_v43 = vmul.f32 %v1924_v40, %v1918_v28 }
 0xd9f   : > { %v1921_v44 = vpop.f32.mrf.mxu1  ;;  %v1982_v45 = vpop.f32.mrf.mxu0 }
 0xda0   : > { %v1926_v46 = vmul.f32 0.044715, %v1925_v43 }
 0xda1   : > { %v2415_v47 = vpop.f32.mrf.mxu1  ;;  %v2423_v48 = vpop.f32.mrf.mxu0 }
 0xda2   : > { %v1927_v49 = vadd.f32 %v1926_v46, %v1918_v28 }
 0xda4   : > { %v1928_v50 = vmul.f32 0.7978846, %v1927_v49 }
 0xda6   : > { %2517 = vtanh.f32 %v1928_v50 }
 0xdb3   : > { %v2518_v4 = vpop.eup %2517 }
 0xdb4   : > { %v1930_v51 = vadd.f32 1.0, %v2518_v4 }
 0xdb6   : > { %v1931_v52 = vmul.f32 0.5, %v1930_v51 }
 0xdb8   : > { %v1932_v53 = vmul.f32 %v1931_v52, %v1918_v28 }
 0xdba   : > { %v1985_v54 = vmul.f32 %v1979_v39, %v1932_v53 }
 0xdbc   : > { %v1986_v55 = vpack.c.bf16 %v1985_v54, %v1985_v54 }
 0xdbe   : > { %2433 = vmatmul.mubr.msk.bf16.vlgmr.msra.gmra.mxu1 %vm2011_vm7, %v1986_v55 }
 0xe7e   : > { %v2049_v56 = vpop.f32.mrf.mxu1 }
 0xe7f   : > { %v2055_v57 = vadd.f32 %v2049_v56, %v2890_v18 }
 0xe80   : > { %v2434_v58 = vpop.f32.mrf.mxu1 }
 0xe81   : > { %v2057_v59 = vmul.f32 %v2055_v57, %v2055_v57 }
 0xe82   : > { %v2052_v60 = vpop.f32.mrf.mxu1 }
 0xe83   : > { %v2058_v61 = vsel %vm581_vm0, %v2057_v59, 0.0 }
 0xe84   : > { %2059 = vadd.xlane.f32.xlu1 %v2058_v61  ;;  %v2435_v62 = vpop.f32.mrf.mxu1 }
 0xf0d   : > { %v2060_v63 = vpop.xlane.xlu1 %2059 }
 0xf0e   : > { %v2061_v1 = vmul.f32 0.03125, %v2060_v63 }
 0xf10   : > { %v2062_v2 = vadd.f32 1e-06, %v2061_v1 }
 0xf12   : > { %2519 = vrsqrt.f32 %v2062_v2 }
 0xf1f   : > { %v2520_v3 = vpop.eup %2519 }
 0xf20   : > { %v2064_v6 = vmul.f32 %v2520_v3, %v2055_v57 }
 0xf22   : > { %v2071_v8 = vmul.f32 %v2211_v5, %v2064_v6 }
 0xf24   : > { %2072 = vst.msk [vmem:[%s561_s29] sm:$0xff] %vm581_vm0, %v2071_v8 }
 0xf25 PF: > { %s26_s21 = sadd.s32 1, %s2527_s21  }
 0xf26   : > { %p23_p4 = scmp.ge.s32.totalorder %s26_s21, 4  }
 0xf28   :  { %25 = sbr.rel (!%p23_p4) target bundleno = 2 (0x2), region = 123 }

</bundles_post_ra>
